<compile_context>
chip_gen: v6e
topology: v6e:2x2x1
jax: 0.10.0
libtpu: 0.0.40
codegen_flags: <defaults>
</compile_context>

<pallas_src>
import functools

import jax
import jax.numpy as jnp
from jax.experimental import pallas as pl
from jax.experimental.pallas import tpu as pltpu

EPS = 1e-5
LANE = 128
VMEM_LIMIT = 48 * 1024 * 1024  # < 64 MiB physical on v7x, well under v5e/v6e


def _round_up(x, m):
    return (x + m - 1) // m * m


# ------------------------------ Pallas kernels ------------------------------
def _gemm_stats_kernel(p_ref, w_ref, y_ref, stats_ref):
    # One M-tile of Y = P @ W (bf16 x bf16 -> f32 accumulate) plus per-tile
    # per-channel sum / sum-of-squares (partial BatchNorm statistics).
    y = jnp.dot(p_ref[...], w_ref[...], preferred_element_type=jnp.float32)
    y_ref[...] = y
    s = jnp.sum(y, axis=0, keepdims=True)            # (1, C)
    s2 = jnp.sum(y * y, axis=0, keepdims=True)       # (1, C)
    stats_ref[...] = jnp.concatenate([s, s2], axis=0)[None]  # (1, 2, C)


def _scale_bias_relu_kernel(y_ref, s_ref, b_ref, o_ref):
    # relu(bn1(conv1(x))) with BN folded into per-channel scale/bias.
    o_ref[...] = jnp.maximum(y_ref[...] * s_ref[...] + b_ref[...], 0.0)


def _tail_proj_kernel(y2_ref, ys_ref, s2_ref, ss_ref, b_ref, o_ref):
    # relu( bn2(conv2) + bn_s(conv1x1) ), with b = bias2 + bias_s pre-added.
    o_ref[...] = jnp.maximum(
        y2_ref[...] * s2_ref[...] + ys_ref[...] * ss_ref[...] + b_ref[...], 0.0)


def _tail_id_kernel(y2_ref, x_ref, s2_ref, b2_ref, o_ref):
    # relu( bn2(conv2) + x )   (identity shortcut, x kept in f32)
    o_ref[...] = jnp.maximum(
        y2_ref[...] * s2_ref[...] + b2_ref[...] + x_ref[...], 0.0)


# --------------------------- pallas_call wrappers ---------------------------
def _compiler_params():
    return pltpu.CompilerParams(
        dimension_semantics=("parallel",),
        vmem_limit_bytes=VMEM_LIMIT,
    )


def _row_spec(tile_m, ncols):
    return pl.BlockSpec((tile_m, ncols), lambda i: (i, 0))


def _resident_spec(shape):
    nd = len(shape)
    return pl.BlockSpec(shape, lambda i, nd=nd: (0,) * nd)


def gemm_stats(p, w, tile_m):
    m_pad, k = p.shape
    c_pad = w.shape[1]
    nt = m_pad // tile_m
    cost = pl.CostEstimate(
        flops=2 * m_pad * k * c_pad,
        transcendentals=0,
        bytes_accessed=p.size * 2 + w.size * 2
        + m_pad * c_pad * 4 + nt * 2 * c_pad * 4,
    )
    return pl.pallas_call(
        _gemm_stats_kernel,
        out_shape=(jax.ShapeDtypeStruct((m_pad, c_pad), jnp.float32),
                   jax.ShapeDtypeStruct((nt, 2, c_pad), jnp.float32)),
        grid=(nt,),
        in_specs=[_row_spec(tile_m, k), _resident_spec((k, c_pad))],
        out_specs=(_row_spec(tile_m, c_pad),
                   pl.BlockSpec((1, 2, c_pad), lambda i: (i, 0, 0))),
        compiler_params=_compiler_params(),
        cost_estimate=cost,
    )(p, w)


def scale_bias_relu(y, scale, bias, tile_m):
    m_pad, c_pad = y.shape
    nt = m_pad // tile_m
    cost = pl.CostEstimate(flops=3 * m_pad * c_pad, transcendentals=0,
                           bytes_accessed=2 * m_pad * c_pad * 4)
    return pl.pallas_call(
        _scale_bias_relu_kernel,
        out_shape=jax.ShapeDtypeStruct((m_pad, c_pad), jnp.float32),
        grid=(nt,),
        in_specs=[_row_spec(tile_m, c_pad),
                  _resident_spec((1, c_pad)), _resident_spec((1, c_pad))],
        out_specs=_row_spec(tile_m, c_pad),
        compiler_params=_compiler_params(),
        cost_estimate=cost,
    )(y, scale, bias)


def tail_proj(y2, ys, s2, ss, b, tile_m):
    m_pad, c_pad = y2.shape
    nt = m_pad // tile_m
    cost = pl.CostEstimate(flops=5 * m_pad * c_pad, transcendentals=0,
                           bytes_accessed=3 * m_pad * c_pad * 4)
    return pl.pallas_call(
        _tail_proj_kernel,
        out_shape=jax.ShapeDtypeStruct((m_pad, c_pad), jnp.float32),
        grid=(nt,),
        in_specs=[_row_spec(tile_m, c_pad), _row_spec(tile_m, c_pad),
                  _resident_spec((1, c_pad)), _resident_spec((1, c_pad)),
                  _resident_spec((1, c_pad))],
        out_specs=_row_spec(tile_m, c_pad),
        compiler_params=_compiler_params(),
        cost_estimate=cost,
    )(y2, ys, s2, ss, b)


def tail_id(y2, xs, s2, b2, tile_m):
    m_pad, c_pad = y2.shape
    nt = m_pad // tile_m
    cost = pl.CostEstimate(flops=4 * m_pad * c_pad, transcendentals=0,
                           bytes_accessed=3 * m_pad * c_pad * 4)
    return pl.pallas_call(
        _tail_id_kernel,
        out_shape=jax.ShapeDtypeStruct((m_pad, c_pad), jnp.float32),
        grid=(nt,),
        in_specs=[_row_spec(tile_m, c_pad), _row_spec(tile_m, c_pad),
                  _resident_spec((1, c_pad)), _resident_spec((1, c_pad))],
        out_specs=_row_spec(tile_m, c_pad),
        compiler_params=_compiler_params(),
        cost_estimate=cost,
    )(y2, xs, s2, b2)


# ------------------------------- JAX glue -----------------------------------
def _im2col(x_nhwc, k, stride, pad):
    N, H, W, C = x_nhwc.shape
    xp = jnp.pad(x_nhwc, ((0, 0), (pad, pad), (pad, pad), (0, 0)))
    Ho = (H + 2 * pad - k) // stride + 1
    Wo = (W + 2 * pad - k) // stride + 1
    cols = [xp[:, di:di + stride * Ho:stride, dj:dj + stride * Wo:stride, :]
            for di in range(k) for dj in range(k)]
    p = jnp.stack(cols, axis=3)                       # (N, Ho, Wo, k*k, C)
    return p.reshape(N * Ho * Wo, k * k * C)


def _pad_rows(a, m_pad):
    return jnp.pad(a, ((0, m_pad - a.shape[0]), (0, 0)))


def _pad_chan_vec(v, c_pad):
    return jnp.pad(v.astype(jnp.float32), (0, c_pad - v.shape[0]))


def _prep_conv_w(w, cin_pad, cout_pad):
    cout, cin, kh, kw = w.shape
    w = jnp.transpose(w, (2, 3, 1, 0))                # (kh, kw, Cin, Cout)
    w = jnp.pad(w, ((0, 0), (0, 0), (0, cin_pad - cin), (0, cout_pad - cout)))
    return w.reshape(kh * kw * cin_pad, cout_pad).astype(jnp.bfloat16)


def _prep_proj_w(w, cin_pad, cout_pad):
    cout, cin = w.shape[0], w.shape[1]
    w = w.reshape(cout, cin).T                        # (Cin, Cout)
    w = jnp.pad(w, ((0, cin_pad - cin), (0, cout_pad - cout)))
    return w.astype(jnp.bfloat16)


def _finish_stats(stats, m_real):
    s = jnp.sum(stats[:, 0, :], axis=0)
    s2 = jnp.sum(stats[:, 1, :], axis=0)
    mu = s / m_real
    # one-pass variance (E[y^2]-E[y]^2); activations are ~zero-mean post-conv,
    # so f32 cancellation is not a concern at these scales.
    var = jnp.maximum(s2 / m_real - mu * mu, 0.0)
    return mu, var


def _fold_bn(gamma, beta, mu, var):
    scale = gamma * jax.lax.rsqrt(var + EPS)
    bias = beta - mu * scale
    return scale.reshape(1, -1), bias.reshape(1, -1)


def _choose_tile_m(m):
    m8 = _round_up(m, 8)
    return m8 if m8 <= 512 else 512


@functools.partial(jax.jit, static_argnames=("stride",))
def basic_block_forward(x_nchw, params, stride):
    N, Cin, H, W = x_nchw.shape
    Cout = params["w1"].shape[0]
    cin_p = _round_up(Cin, LANE)
    cout_p = _round_up(Cout, LANE)

    Ho = (H + 2 - 3) // stride + 1
    Wo = (W + 2 - 3) // stride + 1
    M = N * Ho * Wo
    tile_m = _choose_tile_m(M)
    m_pad = _round_up(M, tile_m)

    x = jnp.transpose(x_nchw, (0, 2, 3, 1)).astype(jnp.float32)      # NHWC
    x = jnp.pad(x, ((0, 0), (0, 0), (0, 0), (0, cin_p - Cin)))       # lane pad

    # ---- conv1 (3x3, stride, pad 1): tiled GEMM + partial BN stats ----
    p1 = _pad_rows(_im2col(x.astype(jnp.bfloat16), 3, stride, 1), m_pad)
    w1 = _prep_conv_w(params["w1"], cin_p, cout_p)
    y1, st1 = gemm_stats(p1, w1, tile_m)
    mu1, var1 = _finish_stats(st1, M)
    s1, b1 = _fold_bn(_pad_chan_vec(params["g1"], cout_p),
                      _pad_chan_vec(params["b1"], cout_p), mu1, var1)

    # ---- bn1 + relu (folded scale/bias, tiled elementwise) ----
    a1 = scale_bias_relu(y1, s1, b1, tile_m)
    a1 = a1[:M].reshape(N, Ho, Wo, cout_p)

    # ---- conv2 (3x3, stride 1, pad 1): tiled GEMM + partial BN stats ----
    p2 = _pad_rows(_im2col(a1.astype(jnp.bfloat16), 3, 1, 1), m_pad)
    w2 = _prep_conv_w(params["w2"], cout_p, cout_p)
    y2, st2 = gemm_stats(p2, w2, tile_m)
    mu2, var2 = _finish_stats(st2, M)
    s2, b2 = _fold_bn(_pad_chan_vec(params["g2"], cout_p),
                      _pad_chan_vec(params["b2"], cout_p), mu2, var2)

    has_proj = (stride != 1) or (Cin != Cout)
    if has_proj:
        # 1x1 strided projection shortcut: tiled GEMM + its own BN stats.
        xs = x[:, ::stride, ::stride, :].reshape(M, cin_p)
        ys, sts = gemm_stats(_pad_rows(xs.astype(jnp.bfloat16), m_pad),
                             _prep_proj_w(params["ws"], cin_p, cout_p), tile_m)
        mus, var_s = _finish_stats(sts, M)
        ss, bs = _fold_bn(_pad_chan_vec(params["gs"], cout_p),
                          _pad_chan_vec(params["bs"], cout_p), mus, var_s)
        out = tail_proj(y2, ys, s2, ss, b2 + bs, tile_m)
    else:
        xs = _pad_rows(x.reshape(M, cout_p), m_pad)                  # f32
        out = tail_id(y2, xs, s2, b2, tile_m)

    out = out[:M, :Cout].reshape(N, Ho, Wo, Cout)
    return jnp.transpose(out, (0, 3, 1, 2))                          # NCHW


# ---------------------------- pure-JAX reference ----------------------------
def ref_basic_block(x, p, stride, has_proj):
    def conv(x, w, s, pad):
        # mirror the kernels' bf16 MXU operands (accumulation stays f32)
        return jax.lax.conv_general_dilated(
            x.astype(jnp.bfloat16).astype(jnp.float32),
            w.astype(jnp.bfloat16).astype(jnp.float32),
            window_strides=(s, s), padding=((pad, pad), (pad, pad)),
            dimension_numbers=("NCHW", "OIHW", "NCHW"),
            precision=jax.lax.Precision.HIGHEST)

    def bn(y, g, b):
        mu = y.mean(axis=(0, 2, 3), keepdims=True)
        var = ((y - mu) ** 2).mean(axis=(0, 2, 3), keepdims=True)
        return (y - mu) / jnp.sqrt(var + EPS) * g.reshape(1, -1, 1, 1) \
            + b.reshape(1, -1, 1, 1)

    y = jax.nn.relu(bn(conv(x, p["w1"], stride, 1), p["g1"], p["b1"]))
    y = bn(conv(y, p["w2"], 1, 1), p["g2"], p["b2"])
    s = bn(conv(x, p["ws"], stride, 0), p["gs"], p["bs"]) if has_proj else x
    return jax.nn.relu(y + s)


def make_params(key, cin, cout, has_proj):
    ks = jax.random.split(key, 9)
    p = {
        "w1": 0.1 * jax.random.normal(ks[0], (cout, cin, 3, 3), jnp.float32),
        "g1": 1.0 + 0.1 * jax.random.normal(ks[1], (cout,), jnp.float32),
        "b1": 0.1 * jax.random.normal(ks[2], (cout,), jnp.float32),
        "w2": 0.1 * jax.random.normal(ks[3], (cout, cout, 3, 3), jnp.float32),
        "g2": 1.0 + 0.1 * jax.random.normal(ks[4], (cout,), jnp.float32),
        "b2": 0.1 * jax.random.normal(ks[5], (cout,), jnp.float32),
    }
    if has_proj:
        p["ws"] = 0.1 * jax.random.normal(ks[6], (cout, cin, 1, 1), jnp.float32)
        p["gs"] = 1.0 + 0.1 * jax.random.normal(ks[7], (cout,), jnp.float32)
        p["bs"] = 0.1 * jax.random.normal(ks[8], (cout,), jnp.float32)
    return p


if __name__ == "__main__":
    key = jax.random.PRNGKey(0)
    kx1, kp1, kx2, kp2 = jax.random.split(key, 4)

    # Case 1: downsampling block (stride=2, 4 -> 8 channels, projection shortcut)
    x1 = jax.random.normal(kx1, (2, 4, 16, 16), jnp.float32)
    params1 = make_params(kp1, 4, 8, has_proj=True)
    out1 = basic_block_forward(x1, params1, stride=2)
    jax.block_until_ready(out1)
    ref1 = ref_basic_block(x1, params1, 2, True)
    assert out1.shape == (2, 8, 8, 8)
    assert jnp.allclose(out1, ref1, atol=1e-2, rtol=1e-2), \
        float(jnp.max(jnp.abs(out1 - ref1)))

    # Case 2: identity-shortcut block (stride=1, 8 -> 8 channels)
    x2 = jax.random.normal(kx2, (2, 8, 16, 16), jnp.float32)
    params2 = make_params(kp2, 8, 8, has_proj=False)
    out2 = basic_block_forward(x2, params2, stride=1)
    jax.block_until_ready(out2)
    ref2 = ref_basic_block(x2, params2, 1, False)
    assert out2.shape == (2, 8, 16, 16)
    assert jnp.allclose(out2, ref2, atol=1e-2, rtol=1e-2), \
        float(jnp.max(jnp.abs(out2 - ref2)))

    print("KERNEL_OK")
</pallas_src>

<mosaic_0001>
module attributes {stable_mosaic.version = 11 : i64} {
  func.func @_gemm_stats_kernel(%arg0: i32, %arg1: memref<128x1152xbf16, #tpu.memory_space<vmem>>, %arg2: memref<1152x128xbf16, #tpu.memory_space<vmem>>, %arg3: memref<128x128xf32, #tpu.memory_space<vmem>>, %arg4: memref<1x2x128xf32, #tpu.memory_space<vmem>>) attributes {dimension_semantics = [#tpu.dimension_semantics<parallel>], iteration_bounds = array<i64: 1>, scalar_prefetch = 0 : i64, scratch_operands = 0 : i64, tpu.core_type = #tpu.core_type<tc>, window_params = [{transform_indices = @transform_0, window_bounds = array<i64: 128, 1152>}, {pipeline_mode = #tpu.pipeline_mode<synchronous>, transform_indices = @transform_1, window_bounds = array<i64: 1152, 128>}, {transform_indices = @transform_2, window_bounds = array<i64: 128, 128>}, {transform_indices = @transform_3, window_bounds = array<i64: 1, 2, 128>}]} {
    %c0 = arith.constant 0 : index
    %c0_0 = arith.constant 0 : index
    %0 = vector.load %arg1[%c0, %c0_0] : memref<128x1152xbf16, #tpu.memory_space<vmem>>, vector<128x1152xbf16>
    %c0_1 = arith.constant 0 : index
    %c0_2 = arith.constant 0 : index
    %1 = vector.load %arg2[%c0_1, %c0_2] : memref<1152x128xbf16, #tpu.memory_space<vmem>>, vector<1152x128xbf16>
    %cst = arith.constant dense<0.000000e+00> : vector<128x128xf32>
    %2 = tpu.matmul %0, %1, %cst {dimension_numbers = #tpu.dot_dimension_numbers<[1], [0], [0], [1], [0, 0, 1, 1], [], []>} : vector<128x1152xbf16>, vector<1152x128xbf16>, vector<128x128xf32> -> vector<128x128xf32>
    %c0_3 = arith.constant 0 : index
    %c0_4 = arith.constant 0 : index
    %3 = vector.load %arg3[%c0_3, %c0_4] : memref<128x128xf32, #tpu.memory_space<vmem>>, vector<128x128xf32>
    tpu.vector_store %arg3[%c0_3, %c0_4], %2 {strides = array<i32>} : memref<128x128xf32, #tpu.memory_space<vmem>>, vector<128x128xf32>,
    %cst_5 = arith.constant dense<0.000000e+00> : vector<128xf32>
    %4 = vector.multi_reduction <add>, %2, %cst_5 [0] : vector<128x128xf32> to vector<128xf32>
    %5 = vector.shape_cast %4 : vector<128xf32> to vector<1x128xf32>
    %6 = arith.mulf %2, %2 : vector<128x128xf32>
    %cst_6 = arith.constant dense<0.000000e+00> : vector<128xf32>
    %7 = vector.multi_reduction <add>, %6, %cst_6 [0] : vector<128x128xf32> to vector<128xf32>
    %8 = vector.shape_cast %7 : vector<128xf32> to vector<1x128xf32>
    %9 = tpu.concatenate %5, %8 in 0 : vector<1x128xf32>, vector<1x128xf32> -> vector<2x128xf32>
    %10 = vector.shape_cast %9 : vector<2x128xf32> to vector<1x2x128xf32>
    %c0_7 = arith.constant 0 : index
    %c0_8 = arith.constant 0 : index
    %c0_9 = arith.constant 0 : index
    %11 = vector.load %arg4[%c0_7, %c0_8, %c0_9] : memref<1x2x128xf32, #tpu.memory_space<vmem>>, vector<1x2x128xf32>
    tpu.vector_store %arg4[%c0_7, %c0_8, %c0_9], %10 {strides = array<i32>} : memref<1x2x128xf32, #tpu.memory_space<vmem>>, vector<1x2x128xf32>,
    return
  }
  func.func @transform_0(%arg0: i32) -> (i32, i32) {
    %c0_i32 = arith.constant 0 : i32
    %c0_i32_0 = arith.constant 0 : i32
    return %arg0, %c0_i32 : i32, i32
  }
  func.func @transform_1(%arg0: i32) -> (i32, i32) {
    %c0_i32 = arith.constant 0 : i32
    %c0_i32_0 = arith.constant 0 : i32
    %c0_i32_1 = arith.constant 0 : i32
    return %c0_i32, %c0_i32_0 : i32, i32
  }
  func.func @transform_2(%arg0: i32) -> (i32, i32) {
    %c0_i32 = arith.constant 0 : i32
    %c0_i32_0 = arith.constant 0 : i32
    return %arg0, %c0_i32 : i32, i32
  }
  func.func @transform_3(%arg0: i32) -> (i32, i32, i32) {
    %c0_i32 = arith.constant 0 : i32
    %c0_i32_0 = arith.constant 0 : i32
    %c0_i32_1 = arith.constant 0 : i32
    return %arg0, %c0_i32, %c0_i32_0 : i32, i32, i32
  }
}

module attributes {stable_mosaic.version = 11 : i64} {
  func.func @_scale_bias_relu_kernel(%arg0: i32, %arg1: memref<128x128xf32, #tpu.memory_space<vmem>>, %arg2: memref<1x128xf32, #tpu.memory_space<vmem>>, %arg3: memref<1x128xf32, #tpu.memory_space<vmem>>, %arg4: memref<128x128xf32, #tpu.memory_space<vmem>>) attributes {dimension_semantics = [#tpu.dimension_semantics<parallel>], iteration_bounds = array<i64: 1>, scalar_prefetch = 0 : i64, scratch_operands = 0 : i64, tpu.core_type = #tpu.core_type<tc>, window_params = [{transform_indices = @transform_0, window_bounds = array<i64: 128, 128>}, {pipeline_mode = #tpu.pipeline_mode<synchronous>, transform_indices = @transform_1, window_bounds = array<i64: 1, 128>}, {pipeline_mode = #tpu.pipeline_mode<synchronous>, transform_indices = @transform_2, window_bounds = array<i64: 1, 128>}, {transform_indices = @transform_3, window_bounds = array<i64: 128, 128>}]} {
    %c0 = arith.constant 0 : index
    %c0_0 = arith.constant 0 : index
    %0 = vector.load %arg1[%c0, %c0_0] : memref<128x128xf32, #tpu.memory_space<vmem>>, vector<128x128xf32>
    %c0_1 = arith.constant 0 : index
    %c0_2 = arith.constant 0 : index
    %1 = vector.load %arg2[%c0_1, %c0_2] : memref<1x128xf32, #tpu.memory_space<vmem>>, vector<1x128xf32>
    %2 = vector.broadcast %1 : vector<1x128xf32> to vector<128x128xf32>
    %3 = arith.mulf %0, %2 : vector<128x128xf32>
    %c0_3 = arith.constant 0 : index
    %c0_4 = arith.constant 0 : index
    %4 = vector.load %arg3[%c0_3, %c0_4] : memref<1x128xf32, #tpu.memory_space<vmem>>, vector<1x128xf32>
    %5 = vector.broadcast %4 : vector<1x128xf32> to vector<128x128xf32>
    %6 = arith.addf %3, %5 : vector<128x128xf32>
    %cst = arith.constant 0.000000e+00 : f32
    %7 = vector.broadcast %cst : f32 to vector<128x128xf32>
    %8 = arith.maximumf %6, %7 : vector<128x128xf32>
    %c0_5 = arith.constant 0 : index
    %c0_6 = arith.constant 0 : index
    %9 = vector.load %arg4[%c0_5, %c0_6] : memref<128x128xf32, #tpu.memory_space<vmem>>, vector<128x128xf32>
    tpu.vector_store %arg4[%c0_5, %c0_6], %8 {strides = array<i32>} : memref<128x128xf32, #tpu.memory_space<vmem>>, vector<128x128xf32>,
    return
  }
  func.func @transform_0(%arg0: i32) -> (i32, i32) {
    %c0_i32 = arith.constant 0 : i32
    %c0_i32_0 = arith.constant 0 : i32
    return %arg0, %c0_i32 : i32, i32
  }
  func.func @transform_1(%arg0: i32) -> (i32, i32) {
    %c0_i32 = arith.constant 0 : i32
    %c0_i32_0 = arith.constant 0 : i32
    %c0_i32_1 = arith.constant 0 : i32
    return %c0_i32, %c0_i32_0 : i32, i32
  }
  func.func @transform_2(%arg0: i32) -> (i32, i32) {
    %c0_i32 = arith.constant 0 : i32
    %c0_i32_0 = arith.constant 0 : i32
    %c0_i32_1 = arith.constant 0 : i32
    return %c0_i32, %c0_i32_0 : i32, i32
  }
  func.func @transform_3(%arg0: i32) -> (i32, i32) {
    %c0_i32 = arith.constant 0 : i32
    %c0_i32_0 = arith.constant 0 : i32
    return %arg0, %c0_i32 : i32, i32
  }
}

module attributes {stable_mosaic.version = 11 : i64} {
  func.func @_gemm_stats_kernel(%arg0: i32, %arg1: memref<128x128xbf16, #tpu.memory_space<vmem>>, %arg2: memref<128x128xbf16, #tpu.memory_space<vmem>>, %arg3: memref<128x128xf32, #tpu.memory_space<vmem>>, %arg4: memref<1x2x128xf32, #tpu.memory_space<vmem>>) attributes {dimension_semantics = [#tpu.dimension_semantics<parallel>], iteration_bounds = array<i64: 1>, scalar_prefetch = 0 : i64, scratch_operands = 0 : i64, tpu.core_type = #tpu.core_type<tc>, window_params = [{transform_indices = @transform_0, window_bounds = array<i64: 128, 128>}, {pipeline_mode = #tpu.pipeline_mode<synchronous>, transform_indices = @transform_1, window_bounds = array<i64: 128, 128>}, {transform_indices = @transform_2, window_bounds = array<i64: 128, 128>}, {transform_indices = @transform_3, window_bounds = array<i64: 1, 2, 128>}]} {
    %c0 = arith.constant 0 : index
    %c0_0 = arith.constant 0 : index
    %0 = vector.load %arg1[%c0, %c0_0] : memref<128x128xbf16, #tpu.memory_space<vmem>>, vector<128x128xbf16>
    %c0_1 = arith.constant 0 : index
    %c0_2 = arith.constant 0 : index
    %1 = vector.load %arg2[%c0_1, %c0_2] : memref<128x128xbf16, #tpu.memory_space<vmem>>, vector<128x128xbf16>
    %cst = arith.constant dense<0.000000e+00> : vector<128x128xf32>
    %2 = tpu.matmul %0, %1, %cst {dimension_numbers = #tpu.dot_dimension_numbers<[1], [0], [0], [1], [0, 0, 1, 1], [], []>} : vector<128x128xbf16>, vector<128x128xbf16>, vector<128x128xf32> -> vector<128x128xf32>
    %c0_3 = arith.constant 0 : index
    %c0_4 = arith.constant 0 : index
    %3 = vector.load %arg3[%c0_3, %c0_4] : memref<128x128xf32, #tpu.memory_space<vmem>>, vector<128x128xf32>
    tpu.vector_store %arg3[%c0_3, %c0_4], %2 {strides = array<i32>} : memref<128x128xf32, #tpu.memory_space<vmem>>, vector<128x128xf32>,
    %cst_5 = arith.constant dense<0.000000e+00> : vector<128xf32>
    %4 = vector.multi_reduction <add>, %2, %cst_5 [0] : vector<128x128xf32> to vector<128xf32>
    %5 = vector.shape_cast %4 : vector<128xf32> to vector<1x128xf32>
    %6 = arith.mulf %2, %2 : vector<128x128xf32>
    %cst_6 = arith.constant dense<0.000000e+00> : vector<128xf32>
    %7 = vector.multi_reduction <add>, %6, %cst_6 [0] : vector<128x128xf32> to vector<128xf32>
    %8 = vector.shape_cast %7 : vector<128xf32> to vector<1x128xf32>
    %9 = tpu.concatenate %5, %8 in 0 : vector<1x128xf32>, vector<1x128xf32> -> vector<2x128xf32>
    %10 = vector.shape_cast %9 : vector<2x128xf32> to vector<1x2x128xf32>
    %c0_7 = arith.constant 0 : index
    %c0_8 = arith.constant 0 : index
    %c0_9 = arith.constant 0 : index
    %11 = vector.load %arg4[%c0_7, %c0_8, %c0_9] : memref<1x2x128xf32, #tpu.memory_space<vmem>>, vector<1x2x128xf32>
    tpu.vector_store %arg4[%c0_7, %c0_8, %c0_9], %10 {strides = array<i32>} : memref<1x2x128xf32, #tpu.memory_space<vmem>>, vector<1x2x128xf32>,
    return
  }
  func.func @transform_0(%arg0: i32) -> (i32, i32) {
    %c0_i32 = arith.constant 0 : i32
    %c0_i32_0 = arith.constant 0 : i32
    return %arg0, %c0_i32 : i32, i32
  }
  func.func @transform_1(%arg0: i32) -> (i32, i32) {
    %c0_i32 = arith.constant 0 : i32
    %c0_i32_0 = arith.constant 0 : i32
    %c0_i32_1 = arith.constant 0 : i32
    return %c0_i32, %c0_i32_0 : i32, i32
  }
  func.func @transform_2(%arg0: i32) -> (i32, i32) {
    %c0_i32 = arith.constant 0 : i32
    %c0_i32_0 = arith.constant 0 : i32
    return %arg0, %c0_i32 : i32, i32
  }
  func.func @transform_3(%arg0: i32) -> (i32, i32, i32) {
    %c0_i32 = arith.constant 0 : i32
    %c0_i32_0 = arith.constant 0 : i32
    %c0_i32_1 = arith.constant 0 : i32
    return %arg0, %c0_i32, %c0_i32_0 : i32, i32, i32
  }
}

module attributes {stable_mosaic.version = 11 : i64} {
  func.func @_tail_proj_kernel(%arg0: i32, %arg1: memref<128x128xf32, #tpu.memory_space<vmem>>, %arg2: memref<128x128xf32, #tpu.memory_space<vmem>>, %arg3: memref<1x128xf32, #tpu.memory_space<vmem>>, %arg4: memref<1x128xf32, #tpu.memory_space<vmem>>, %arg5: memref<1x128xf32, #tpu.memory_space<vmem>>, %arg6: memref<128x128xf32, #tpu.memory_space<vmem>>) attributes {dimension_semantics = [#tpu.dimension_semantics<parallel>], iteration_bounds = array<i64: 1>, scalar_prefetch = 0 : i64, scratch_operands = 0 : i64, tpu.core_type = #tpu.core_type<tc>, window_params = [{transform_indices = @transform_0, window_bounds = array<i64: 128, 128>}, {transform_indices = @transform_1, window_bounds = array<i64: 128, 128>}, {pipeline_mode = #tpu.pipeline_mode<synchronous>, transform_indices = @transform_2, window_bounds = array<i64: 1, 128>}, {pipeline_mode = #tpu.pipeline_mode<synchronous>, transform_indices = @transform_3, window_bounds = array<i64: 1, 128>}, {pipeline_mode = #tpu.pipeline_mode<synchronous>, transform_indices = @transform_4, window_bounds = array<i64: 1, 128>}, {transform_indices = @transform_5, window_bounds = array<i64: 128, 128>}]} {
    %c0 = arith.constant 0 : index
    %c0_0 = arith.constant 0 : index
    %0 = vector.load %arg1[%c0, %c0_0] : memref<128x128xf32, #tpu.memory_space<vmem>>, vector<128x128xf32>
    %c0_1 = arith.constant 0 : index
    %c0_2 = arith.constant 0 : index
    %1 = vector.load %arg3[%c0_1, %c0_2] : memref<1x128xf32, #tpu.memory_space<vmem>>, vector<1x128xf32>
    %2 = vector.broadcast %1 : vector<1x128xf32> to vector<128x128xf32>
    %3 = arith.mulf %0, %2 : vector<128x128xf32>
    %c0_3 = arith.constant 0 : index
    %c0_4 = arith.constant 0 : index
    %4 = vector.load %arg2[%c0_3, %c0_4] : memref<128x128xf32, #tpu.memory_space<vmem>>, vector<128x128xf32>
    %c0_5 = arith.constant 0 : index
    %c0_6 = arith.constant 0 : index
    %5 = vector.load %arg4[%c0_5, %c0_6] : memref<1x128xf32, #tpu.memory_space<vmem>>, vector<1x128xf32>
    %6 = vector.broadcast %5 : vector<1x128xf32> to vector<128x128xf32>
    %7 = arith.mulf %4, %6 : vector<128x128xf32>
    %8 = arith.addf %3, %7 : vector<128x128xf32>
    %c0_7 = arith.constant 0 : index
    %c0_8 = arith.constant 0 : index
    %9 = vector.load %arg5[%c0_7, %c0_8] : memref<1x128xf32, #tpu.memory_space<vmem>>, vector<1x128xf32>
    %10 = vector.broadcast %9 : vector<1x128xf32> to vector<128x128xf32>
    %11 = arith.addf %8, %10 : vector<128x128xf32>
    %cst = arith.constant 0.000000e+00 : f32
    %12 = vector.broadcast %cst : f32 to vector<128x128xf32>
    %13 = arith.maximumf %11, %12 : vector<128x128xf32>
    %c0_9 = arith.constant 0 : index
    %c0_10 = arith.constant 0 : index
    %14 = vector.load %arg6[%c0_9, %c0_10] : memref<128x128xf32, #tpu.memory_space<vmem>>, vector<128x128xf32>
    tpu.vector_store %arg6[%c0_9, %c0_10], %13 {strides = array<i32>} : memref<128x128xf32, #tpu.memory_space<vmem>>, vector<128x128xf32>,
    return
  }
  func.func @transform_0(%arg0: i32) -> (i32, i32) {
    %c0_i32 = arith.constant 0 : i32
    %c0_i32_0 = arith.constant 0 : i32
    return %arg0, %c0_i32 : i32, i32
  }
  func.func @transform_1(%arg0: i32) -> (i32, i32) {
    %c0_i32 = arith.constant 0 : i32
    %c0_i32_0 = arith.constant 0 : i32
    return %arg0, %c0_i32 : i32, i32
  }
  func.func @transform_2(%arg0: i32) -> (i32, i32) {
    %c0_i32 = arith.constant 0 : i32
    %c0_i32_0 = arith.constant 0 : i32
    %c0_i32_1 = arith.constant 0 : i32
    return %c0_i32, %c0_i32_0 : i32, i32
  }
  func.func @transform_3(%arg0: i32) -> (i32, i32) {
    %c0_i32 = arith.constant 0 : i32
    %c0_i32_0 = arith.constant 0 : i32
    %c0_i32_1 = arith.constant 0 : i32
    return %c0_i32, %c0_i32_0 : i32, i32
  }
  func.func @transform_4(%arg0: i32) -> (i32, i32) {
    %c0_i32 = arith.constant 0 : i32
    %c0_i32_0 = arith.constant 0 : i32
    %c0_i32_1 = arith.constant 0 : i32
    return %c0_i32, %c0_i32_0 : i32, i32
  }
  func.func @transform_5(%arg0: i32) -> (i32, i32) {
    %c0_i32 = arith.constant 0 : i32
    %c0_i32_0 = arith.constant 0 : i32
    return %arg0, %c0_i32 : i32, i32
  }
}

</mosaic_0001>

<bundles_post_ra>
// kernel: basic_block_forward.6
= control target key start
LH: loop header
LB: loop body
LE: loop exit
PB: predicated region body
PF: predicated region fallthrough
CT: control target
= control target key end

     0   :  { %s254_s0 = inlined_call_operand.vmem [shape: f32[128,128], index: 0, kind: input, shape index: {}]   ;;  %s255_s1 = inlined_call_operand.vmem [shape: f32[1,128], index: 1, kind: input, shape index: {}]   ;;  %s256_s2 = inlined_call_operand.vmem [shape: f32[1,128], index: 2, kind: input, shape index: {}]   ;;  %s257_s3 = inlined_call_operand.vmem [shape: f32[128,128], index: 3, kind: output, shape index: {}]  }
   0x1   :  { %v14_v0 = vld [vmem:[%s254_s0] sm:$0xff]  ;;  %v15_v4 = vld [vmem:[%s254_s0 + $0x8] sm:$0xff]  ;;  %v16_v5 = vld [vmem:[%s254_s0 + $0x10] sm:$0xff] }
   0x2   :  { %v112_v1 = vld [vmem:[%s255_s1] ss:$0 sm:$0xff]  ;;  %v17_v6 = vld [vmem:[%s254_s0 + $0x18] sm:$0xff]  ;;  %v19_v11 = vld [vmem:[%s254_s0 + $0x28] sm:$0xff] }
   0x3   :  { %v143_v2 = vld [vmem:[%s256_s2] ss:$0 sm:$0xff]  ;;  %v37_v3 = vmul.f32 %v112_v1, %v14_v0  ;;  %v38_v7 = vmul.f32 %v112_v1, %v15_v4  ;;  %v39_v8 = vmul.f32 %v112_v1, %v16_v5  ;;  %v40_v9 = vmul.f32 %v112_v1, %v17_v6  ;;  %v20_v12 = vld [vmem:[%s254_s0 + $0x30] sm:$0xff]  ;;  %v21_v17 = vld [vmem:[%s254_s0 + $0x38] sm:$0xff] }
   0x4   :  { %v18_v10 = vld [vmem:[%s254_s0 + $0x20] sm:$0xff]  ;;  %v42_v15 = vmul.f32 %v112_v1, %v19_v11  ;;  %v43_v16 = vmul.f32 %v112_v1, %v20_v12  ;;  %v44_v21 = vmul.f32 %v112_v1, %v21_v17  ;;  %v23_v27 = vld [vmem:[%s254_s0 + $0x48] sm:$0xff]  ;;  %v24_v28 = vld [vmem:[%s254_s0 + $0x50] sm:$0xff] }
   0x5   :  { %v60_v13 = vadd.f32 %v143_v2, %v37_v3  ;;  %v41_v14 = vmul.f32 %v112_v1, %v18_v10  ;;  %v61_v18 = vadd.f32 %v143_v2, %v38_v7  ;;  %v62_v19 = vadd.f32 %v143_v2, %v39_v8  ;;  %v22_v22 = vld [vmem:[%s254_s0 + $0x40] sm:$0xff]  ;;  %v25_v29 = vld [vmem:[%s254_s0 + $0x58] sm:$0xff]  ;;  %v27_v35 = vld [vmem:[%s254_s0 + $0x68] sm:$0xff] }
   0x6   :  { %v63_v20 = vadd.f32 %v143_v2, %v40_v9  ;;  %v65_v25 = vadd.f32 %v143_v2, %v42_v15  ;;  %v66_v26 = vadd.f32 %v143_v2, %v43_v16  ;;  %v67_v33 = vadd.f32 %v143_v2, %v44_v21  ;;  %v26_v34 = vld [vmem:[%s254_s0 + $0x60] sm:$0xff]  ;;  %v28_v36 = vld [vmem:[%s254_s0 + $0x70] sm:$0xff]  ;;  %v29_v41 = vld [vmem:[%s254_s0 + $0x78] sm:$0xff] }
   0x7   :  { %v76_v23 = vmax.f32 %v60_v13, 0.0  ;;  %v64_v24 = vadd.f32 %v143_v2, %v41_v14  ;;  %v77_v30 = vmax.f32 %v61_v18, 0.0  ;;  %v78_v31 = vmax.f32 %v62_v19, 0.0 }
   0x8   :  { %v79_v32 = vmax.f32 %v63_v20, 0.0  ;;  %v81_v38 = vmax.f32 %v65_v25, 0.0  ;;  %v82_v39 = vmax.f32 %v66_v26, 0.0  ;;  %v45_v40 = vmul.f32 %v112_v1, %v22_v22 }
   0x9   :  { %92 = vst [vmem:[%s257_s3] sm:$0xff] %v76_v23  ;;  %v80_v37 = vmax.f32 %v64_v24, 0.0  ;;  %93 = vst [vmem:[%s257_s3 + $0x8] sm:$0xff] %v77_v30  ;;  %v83_v42 = vmax.f32 %v67_v33, 0.0  ;;  %v46_v43 = vmul.f32 %v112_v1, %v23_v27  ;;  %v47_v44 = vmul.f32 %v112_v1, %v24_v28 }
   0xa   :  { %94 = vst [vmem:[%s257_s3 + $0x10] sm:$0xff] %v78_v31  ;;  %95 = vst [vmem:[%s257_s3 + $0x18] sm:$0xff] %v79_v32  ;;  %v48_v45 = vmul.f32 %v112_v1, %v25_v29  ;;  %v68_v46 = vadd.f32 %v143_v2, %v45_v40  ;;  %v49_v47 = vmul.f32 %v112_v1, %v26_v34 }
   0xb   :  { %96 = vst [vmem:[%s257_s3 + $0x20] sm:$0xff] %v80_v37  ;;  %97 = vst [vmem:[%s257_s3 + $0x28] sm:$0xff] %v81_v38  ;;  %v50_v48 = vmul.f32 %v112_v1, %v27_v35  ;;  %v51_v49 = vmul.f32 %v112_v1, %v28_v36  ;;  %v69_v50 = vadd.f32 %v143_v2, %v46_v43 }
   0xc   :  { %98 = vst [vmem:[%s257_s3 + $0x30] sm:$0xff] %v82_v39  ;;  %99 = vst [vmem:[%s257_s3 + $0x38] sm:$0xff] %v83_v42  ;;  %v70_v51 = vadd.f32 %v143_v2, %v47_v44  ;;  %v71_v52 = vadd.f32 %v143_v2, %v48_v45  ;;  %v52_v53 = vmul.f32 %v112_v1, %v29_v41  ;;  %v84_v54 = vmax.f32 %v68_v46, 0.0 }
   0xd   :  { %v72_v55 = vadd.f32 %v143_v2, %v49_v47  ;;  %v73_v56 = vadd.f32 %v143_v2, %v50_v48  ;;  %v74_v57 = vadd.f32 %v143_v2, %v51_v49  ;;  %v85_v58 = vmax.f32 %v69_v50, 0.0 }
   0xe   :  { %v86_v59 = vmax.f32 %v70_v51, 0.0  ;;  %v87_v60 = vmax.f32 %v71_v52, 0.0  ;;  %v75_v61 = vadd.f32 %v143_v2, %v52_v53  ;;  %100 = vst [vmem:[%s257_s3 + $0x40] sm:$0xff] %v84_v54 }
   0xf   :  { %v88_v62 = vmax.f32 %v72_v55, 0.0  ;;  %v89_v63 = vmax.f32 %v73_v56, 0.0  ;;  %v90_v0 = vmax.f32 %v74_v57, 0.0  ;;  %101 = vst [vmem:[%s257_s3 + $0x48] sm:$0xff] %v85_v58 }
  0x10   :  { %102 = vst [vmem:[%s257_s3 + $0x50] sm:$0xff] %v86_v59  ;;  %103 = vst [vmem:[%s257_s3 + $0x58] sm:$0xff] %v87_v60  ;;  %v91_v1 = vmax.f32 %v75_v61, 0.0 }
  0x11   :  { %104 = vst [vmem:[%s257_s3 + $0x60] sm:$0xff] %v88_v62  ;;  %105 = vst [vmem:[%s257_s3 + $0x68] sm:$0xff] %v89_v63 }
  0x12   :  { %106 = vst [vmem:[%s257_s3 + $0x70] sm:$0xff] %v90_v0  ;;  %107 = vst [vmem:[%s257_s3 + $0x78] sm:$0xff] %v91_v1 }

// kernel: basic_block_forward.5
= control target key start
LH: loop header
LB: loop body
LE: loop exit
PB: predicated region body
PF: predicated region fallthrough
CT: control target
= control target key end

     0   :  { %vm1597_vm0 = vcmask 1040384   ;;  %s2871_s1 = inlined_call_operand.vmem [shape: bf16[1152,128], index: 1, kind: input, shape index: {}]   ;;  %s2872_s0 = inlined_call_operand.vmem [shape: bf16[128,1152], index: 0, kind: input, shape index: {}]   ;;  %s2873_s2 = inlined_call_operand.vmem [shape: f32[128,128], index: 2, kind: output, shape index: {0}]   ;;  %s2874_s3 = inlined_call_operand.vmem [shape: f32[1,2,128], index: 3, kind: output, shape index: {1}]  }
   0x1   :  { %v2072_v0 = vld [vmem:[%s2871_s1 + $0x78] sm:$0xff]   ;;  %v2076_v4 = vld [vmem:[%s2871_s1 + $0x70] sm:$0xff]   ;;  %v2080_v8 = vld [vmem:[%s2871_s1 + $0x68] sm:$0xff]  }
   0x2   :  { %v2073_v1 = vld [vmem:[%s2871_s1 + $0xf8] sm:$0xff]   ;;  %1752 = vmatprep.subr.bf16.mxu0 %v2072_v0  ;;  %v2077_v5 = vld [vmem:[%s2871_s1 + $0xf0] sm:$0xff]   ;;  %v2081_v9 = vld [vmem:[%s2871_s1 + $0xe8] sm:$0xff]  }
   0x3   :  { %v2074_v2 = vld [vmem:[%s2871_s1 + $0x38] sm:$0xff]   ;;  %1816 = vmatprep.subr.bf16.mxu1 %v2073_v1  ;;  %v2078_v6 = vld [vmem:[%s2871_s1 + $0x30] sm:$0xff]   ;;  %v2082_v10 = vld [vmem:[%s2871_s1 + $0x28] sm:$0xff]  }
   0x4   :  { %v2075_v3 = vld [vmem:[%s2871_s1 + $0xb8] sm:$0xff]   ;;  %1753 = vmatpush3.bf16.msra.mxu0 %v2074_v2  ;;  %v2079_v7 = vld [vmem:[%s2871_s1 + $0xb0] sm:$0xff]   ;;  %v2083_v11 = vld [vmem:[%s2871_s1 + $0xa8] sm:$0xff]  }
   0x5   :  { %1817 = vmatpush3.bf16.msra.mxu1 %v2075_v3  ;;  %1754 = vmatprep.subr.bf16.mxu0 %v2076_v4  ;;  %v2084_v12 = vld [vmem:[%s2871_s1 + $0x60] sm:$0xff]   ;;  %v2088_v16 = vld [vmem:[%s2871_s1 + $0x58] sm:$0xff]   ;;  %v2092_v20 = vld [vmem:[%s2871_s1 + $0x50] sm:$0xff]  }
   0x6   :  { %1818 = vmatprep.subr.bf16.mxu1 %v2077_v5  ;;  %v2085_v13 = vld [vmem:[%s2871_s1 + $0xe0] sm:$0xff]   ;;  %v2089_v17 = vld [vmem:[%s2871_s1 + $0xd8] sm:$0xff]   ;;  %v2093_v21 = vld [vmem:[%s2871_s1 + $0xd0] sm:$0xff]  }
   0x7   :  { %v2086_v14 = vld [vmem:[%s2871_s1 + $0x20] sm:$0xff]   ;;  %v2090_v18 = vld [vmem:[%s2871_s1 + $0x18] sm:$0xff]   ;;  %v2094_v22 = vld [vmem:[%s2871_s1 + $0x10] sm:$0xff]  }
   0x8   :  { %1755 = vmatpush3.bf16.msra.mxu0 %v2078_v6  ;;  %v2087_v15 = vld [vmem:[%s2871_s1 + $0xa0] sm:$0xff]   ;;  %v2091_v19 = vld [vmem:[%s2871_s1 + $0x98] sm:$0xff]   ;;  %v2095_v23 = vld [vmem:[%s2871_s1 + $0x90] sm:$0xff]  }
   0x9   :  { %1819 = vmatpush3.bf16.msra.mxu1 %v2079_v7  ;;  %1756 = vmatprep.subr.bf16.mxu0 %v2080_v8  ;;  %v2096_v24 = vld [vmem:[%s2871_s1 + $0x48] sm:$0xff]   ;;  %v2100_v28 = vld [vmem:[%s2871_s1 + $0x40] sm:$0xff]   ;;  %v2110_v36 = vld [vmem:[%s2871_s1 + $0x178] sm:$0xff]  }
   0xa   :  { %1820 = vmatprep.subr.bf16.mxu1 %v2081_v9  ;;  %v2097_v25 = vld [vmem:[%s2871_s1 + $0xc8] sm:$0xff]   ;;  %v2101_v29 = vld [vmem:[%s2871_s1 + $0xc0] sm:$0xff]   ;;  %v2111_v37 = vld [vmem:[%s2871_s1 + $0x138] sm:$0xff]  }
   0xb   :  { %v2098_v26 = vld [vmem:[%s2871_s1 + $0x8] sm:$0xff]   ;;  %v2102_v30 = vld [vmem:[%s2871_s1] sm:$0xff]   ;;  %v2114_v39 = vld [vmem:[%s2872_s0 + $0x54] ss:$36 sps:$4 sm:$0xff]  }
   0xc   :  { %1757 = vmatpush3.bf16.msra.mxu0 %v2082_v10  ;;  %v2099_v27 = vld [vmem:[%s2871_s1 + $0x88] sm:$0xff]   ;;  %v2103_v31 = vld [vmem:[%s2871_s1 + $0x80] sm:$0xff]   ;;  %v2117_v41 = vld [vmem:[%s2872_s0 + $0x50] ss:$36 sps:$4 sm:$0xff]  }
   0xd   :  { %1821 = vmatpush3.bf16.msra.mxu1 %v2083_v11  ;;  %1758 = vmatprep.subr.bf16.mxu0 %v2084_v12  ;;  %v2104_v32 = vld [vmem:[%s2872_s0] ss:$36 sps:$4 sm:$0xff]   ;;  %v2107_v34 = vld [vmem:[%s2872_s0 + $0x8] ss:$36 sps:$4 sm:$0xff]   ;;  %v2118_v42 = vld [vmem:[%s2871_s1 + $0x170] sm:$0xff]  }
   0xe   :  { %1822 = vmatprep.subr.bf16.mxu1 %v2085_v13  ;;  %v2106_v33 = vld [vmem:[%s2872_s0 + $0x4] ss:$36 sps:$4 sm:$0xff]   ;;  %v2109_v35 = vld [vmem:[%s2872_s0 + $0xc] ss:$36 sps:$4 sm:$0xff]   ;;  %v2120_v44 = vld [vmem:[%s2872_s0 + $0x94] ss:$36 sps:$4 sm:$0xff]  }
   0xf   :  { %1070 = vmatprep.mubr.bf16.mxu0 %v2106_v33  ;;  %1167 = vmatprep.mubr.bf16.mxu1 %v2109_v35  ;;  %v2112_v38 = vld [vmem:[%s2872_s0 + $0x4c] ss:$36 sps:$4 sm:$0xff]   ;;  %v2122_v45 = vld [vmem:[%s2872_s0 + $0x9c] ss:$36 sps:$4 sm:$0xff]   ;;  %v2132_v53 = vld [vmem:[%s2872_s0 + $0xe4] ss:$36 sps:$4 sm:$0xff]  }
  0x10   :  { %1759 = vmatpush3.bf16.msra.mxu0 %v2086_v14  ;;  %v2116_v40 = vld [vmem:[%s2872_s0 + $0x48] ss:$36 sps:$4 sm:$0xff]   ;;  %v2119_v43 = vld [vmem:[%s2871_s1 + $0x130] sm:$0xff]   ;;  %v2127_v47 = vld [vmem:[%s2871_s1 + $0x1f8] sm:$0xff]  }
  0x11   :  { %1823 = vmatpush3.bf16.msra.mxu1 %v2087_v15  ;;  %1760 = vmatprep.subr.bf16.mxu0 %v2088_v16  ;;  %v2126_v46 = vld [vmem:[%s2871_s1 + $0x168] sm:$0xff]   ;;  %v2124_v48 = vld [vmem:[%s2872_s0 + $0x90] ss:$36 sps:$4 sm:$0xff]   ;;  %v2129_v50 = vld [vmem:[%s2871_s1 + $0x1b8] sm:$0xff]  }
  0x12   :  { %1824 = vmatprep.subr.bf16.mxu1 %v2089_v17  ;;  %v2128_v49 = vld [vmem:[%s2871_s1 + $0x128] sm:$0xff]   ;;  %v2125_v51 = vld [vmem:[%s2872_s0 + $0x98] ss:$36 sps:$4 sm:$0xff]   ;;  %v2136_v54 = vld [vmem:[%s2871_s1 + $0x160] sm:$0xff]  }
  0x13   :  { %v2130_v52 = vld [vmem:[%s2872_s0 + $0xdc] ss:$36 sps:$4 sm:$0xff]   ;;  %v2137_v55 = vld [vmem:[%s2871_s1 + $0x1f0] sm:$0xff]   ;;  %v2140_v60 = vld [vmem:[%s2872_s0 + $0x124] ss:$36 sps:$4 sm:$0xff]  }
  0x14   :  { %1761 = vmatpush3.bf16.msra.mxu0 %v2090_v18  ;;  %v2138_v56 = vld [vmem:[%s2871_s1 + $0x120] sm:$0xff]   ;;  %v2139_v57 = vld [vmem:[%s2871_s1 + $0x1b0] sm:$0xff]   ;;  %v2134_v58 = vld [vmem:[%s2872_s0 + $0xd8] ss:$36 sps:$4 sm:$0xff]  }
  0x15   :  { %1825 = vmatpush3.bf16.msra.mxu1 %v2091_v19  ;;  %1762 = vmatprep.subr.bf16.mxu0 %v2092_v20  ;;  %v2135_v59 = vld [vmem:[%s2872_s0 + $0xe0] ss:$36 sps:$4 sm:$0xff]   ;;  %v2142_v61 = vld [vmem:[%s2872_s0 + $0x12c] ss:$36 sps:$4 sm:$0xff]   ;;  %v2146_v62 = vld [vmem:[%s2871_s1 + $0x158] sm:$0xff]  }
  0x16   :  { %1826 = vmatprep.subr.bf16.mxu1 %v2093_v21  ;;  %v2147_v63 = vld [vmem:[%s2871_s1 + $0x1e8] sm:$0xff]   ;;  %v2148_v0 = vld [vmem:[%s2871_s1 + $0x118] sm:$0xff]   ;;  %v2144_v2 = vld [vmem:[%s2872_s0 + $0x120] ss:$36 sps:$4 sm:$0xff]  }
  0x17   :  { %v2149_v1 = vld [vmem:[%s2871_s1 + $0x1a8] sm:$0xff]   ;;  %v2152_v5 = vld [vmem:[%s2872_s0 + $0x174] ss:$36 sps:$4 sm:$0xff]   ;;  %v2157_v7 = vld [vmem:[%s2871_s1 + $0x1e0] sm:$0xff]  }
  0x18   :  { %1763 = vmatpush3.bf16.msra.mxu0 %v2094_v22  ;;  %v2145_v3 = vld [vmem:[%s2872_s0 + $0x128] ss:$36 sps:$4 sm:$0xff]   ;;  %v2156_v6 = vld [vmem:[%s2871_s1 + $0x150] sm:$0xff]   ;;  %v2159_v9 = vld [vmem:[%s2871_s1 + $0x1a0] sm:$0xff]  }
  0x19   :  { %1827 = vmatpush3.bf16.msra.mxu1 %v2095_v23  ;;  %1764 = vmatprep.subr.bf16.mxu0 %v2096_v24  ;;  %v2150_v4 = vld [vmem:[%s2872_s0 + $0x16c] ss:$36 sps:$4 sm:$0xff]   ;;  %v2160_v12 = vld [vmem:[%s2872_s0 + $0x1b4] ss:$36 sps:$4 sm:$0xff]   ;;  %v2162_v14 = vld [vmem:[%s2872_s0 + $0x1bc] ss:$36 sps:$4 sm:$0xff]  }
  0x1a   :  { %1828 = vmatprep.subr.bf16.mxu1 %v2097_v25  ;;  %v2158_v8 = vld [vmem:[%s2871_s1 + $0x110] sm:$0xff]   ;;  %v2154_v10 = vld [vmem:[%s2872_s0 + $0x168] ss:$36 sps:$4 sm:$0xff]   ;;  %v2167_v15 = vld [vmem:[%s2871_s1 + $0x1d8] sm:$0xff]  }
  0x1b   :  { %v2155_v11 = vld [vmem:[%s2872_s0 + $0x170] ss:$36 sps:$4 sm:$0xff]   ;;  %v2166_v13 = vld [vmem:[%s2871_s1 + $0x148] sm:$0xff]   ;;  %v2169_v17 = vld [vmem:[%s2871_s1 + $0x198] sm:$0xff]  }
  0x1c   :  { %1765 = vmatpush3.bf16.msra.mxu0 %v2098_v26  ;;  %v2168_v16 = vld [vmem:[%s2871_s1 + $0x108] sm:$0xff]   ;;  %v2170_v18 = vld [vmem:[%s2871_s1 + $0x1d0] sm:$0xff]   ;;  %v2165_v21 = vld [vmem:[%s2872_s0 + $0x1b8] ss:$36 sps:$4 sm:$0xff]  }
  0x1d   :  { %1829 = vmatpush3.bf16.msra.mxu1 %v2099_v27  ;;  %1766 = vmatprep.subr.bf16.mxu0 %v2100_v28  ;;  %v2171_v19 = vld [vmem:[%s2871_s1 + $0x190] sm:$0xff]   ;;  %v2172_v22 = vld [vmem:[%s2872_s0 + $0x1fc] ss:$36 sps:$4 sm:$0xff]   ;;  %v2174_v23 = vld [vmem:[%s2872_s0 + $0x204] ss:$36 sps:$4 sm:$0xff]  }
  0x1e   :  { %1830 = vmatprep.subr.bf16.mxu1 %v2101_v29  ;;  %v2164_v20 = vld [vmem:[%s2872_s0 + $0x1b0] ss:$36 sps:$4 sm:$0xff]   ;;  %v2178_v24 = vld [vmem:[%s2871_s1 + $0x140] sm:$0xff]   ;;  %v2179_v25 = vld [vmem:[%s2871_s1 + $0x1c8] sm:$0xff]  }
  0x1f   :  { %v2180_v26 = vld [vmem:[%s2871_s1 + $0x100] sm:$0xff]   ;;  %v2181_v27 = vld [vmem:[%s2871_s1 + $0x188] sm:$0xff]   ;;  %v2176_v29 = vld [vmem:[%s2872_s0 + $0x1f8] ss:$36 sps:$4 sm:$0xff]  }
  0x20   :  { %1767 = vmatpush3.bf16.msra.mxu0 %v2102_v30  ;;  %v2182_v28 = vld [vmem:[%s2871_s1 + $0x1c0] sm:$0xff]   ;;  %v2186_v33 = vld [vmem:[%s2872_s0 + $0x14] ss:$36 sps:$4 sm:$0xff]  }
  0x21   :  { %1831 = vmatpush3.bf16.msra.mxu1 %v2103_v31  ;;  %1880 = vmatprep.subr.bf16.mxu0 %v2110_v36  ;;  %v2177_v30 = vld [vmem:[%s2872_s0 + $0x200] ss:$36 sps:$4 sm:$0xff]   ;;  %v2184_v35 = vld [vmem:[%s2872_s0 + $0x10] ss:$36 sps:$4 sm:$0xff]   ;;  %v2187_v36 = vld [vmem:[%s2872_s0 + $0x18] ss:$36 sps:$4 sm:$0xff]  }
  0x22   :  { %1944 = vmatprep.subr.bf16.mxu1 %v2127_v47  ;;  %v2183_v31 = vld [vmem:[%s2871_s1 + $0x180] sm:$0xff]  }
  0x23   :  { %1071 = vmatmul.mubr.bf16.vlgmr.msra.gmra.mxu0 %v2104_v32  ;;  %v2190_v32 = vld [vmem:[%s2871_s1 + $0x238] sm:$0xff]   ;;  %v2202_v47 = vld [vmem:[%s2872_s0 + $0xa0] ss:$36 sps:$4 sm:$0xff]  }
  0x24   :  { %1168 = vmatmul.mubr.bf16.vlgmr.msra.gmra.mxu1 %v2107_v34  ;;  %1881 = vmatpush3.bf16.msra.mxu0 %v2111_v37  ;;  %v2189_v34 = vld [vmem:[%s2872_s0 + $0x1c] ss:$36 sps:$4 sm:$0xff]  }
  0x25   :  { %1078 = vmatprep.mubr.bf16.mxu0 %v2112_v38  ;;  %1175 = vmatprep.mubr.bf16.mxu1 %v2114_v39  ;;  %v2191_v37 = vld [vmem:[%s2872_s0 + $0x5c] ss:$36 sps:$4 sm:$0xff]   ;;  %v2193_v38 = vld [vmem:[%s2872_s0 + $0x64] ss:$36 sps:$4 sm:$0xff]   ;;  %v2197_v39 = vld [vmem:[%s2871_s1 + $0x230] sm:$0xff]  }
  0x26   :  { %1882 = vmatprep.subr.bf16.mxu0 %v2118_v42  ;;  %1945 = vmatpush3.bf16.msra.mxu1 %v2129_v50  ;;  %v2196_v42 = vld [vmem:[%s2872_s0 + $0x60] ss:$36 sps:$4 sm:$0xff]   ;;  %v2207_v50 = vld [vmem:[%s2872_s0 + $0xf4] ss:$36 sps:$4 sm:$0xff]  }
  0x27   :  { %1946 = vmatprep.subr.bf16.mxu1 %v2137_v55  ;;  %v2212_v55 = vld [vmem:[%s2872_s0 + $0x134] ss:$36 sps:$4 sm:$0xff]  }
  0x28   :  { %1883 = vmatpush3.bf16.msra.mxu0 %v2119_v43  ;;  %v2198_v43 = vld [vmem:[%s2872_s0 + $0xa4] ss:$36 sps:$4 sm:$0xff]  }
  0x29   :  { %1884 = vmatprep.subr.bf16.mxu0 %v2126_v46  ;;  %v2218_v46 = vld [vmem:[%s2871_s1 + $0x218] sm:$0xff]  }
  0x2a   :  { %1947 = vmatpush3.bf16.msra.mxu1 %v2139_v57  ;;  %v2239_v57 = vld [vmem:[%s2871_s1 + $0x200] sm:$0xff]  }
  0x2b   :  { %1079 = vmatmul.mubr.bf16.gmra.mxu0 %v2116_v40  ;;  %1948 = vmatprep.subr.bf16.mxu1 %v2147_v63  ;;  %v2204_v40 = vld [vmem:[%s2871_s1 + $0x228] sm:$0xff]   ;;  %v2224_v63 = vld [vmem:[%s2872_s0 + $0x180] ss:$36 sps:$4 sm:$0xff]  }
  0x2c   :  { %1176 = vmatmul.mubr.bf16.gmra.mxu1 %v2117_v41  ;;  %1086 = vmatprep.mubr.bf16.mxu0 %v2120_v44  ;;  %v2195_v41 = vld [vmem:[%s2872_s0 + $0x58] ss:$36 sps:$4 sm:$0xff]   ;;  %v2200_v44 = vld [vmem:[%s2872_s0 + $0xac] ss:$36 sps:$4 sm:$0xff]  }
  0x2d   :  { %1183 = vmatprep.mubr.bf16.mxu1 %v2122_v45  ;;  %1885 = vmatpush3.bf16.msra.mxu0 %v2128_v49  ;;  %v2211_v45 = vld [vmem:[%s2871_s1 + $0x220] sm:$0xff]   ;;  %v2205_v49 = vld [vmem:[%s2872_s0 + $0xec] ss:$36 sps:$4 sm:$0xff]  }
  0x2e   :  { %1886 = vmatprep.subr.bf16.mxu0 %v2136_v54  ;;  %1949 = vmatpush3.bf16.msra.mxu1 %v2149_v1  ;;  %v2210_v54 = vld [vmem:[%s2872_s0 + $0xf0] ss:$36 sps:$4 sm:$0xff]  }
  0x2f   :  { %1950 = vmatprep.subr.bf16.mxu1 %v2157_v7  ;;  %v2228_v1 = vld [vmem:[%s2872_s0 + $0x1cc] ss:$36 sps:$4 sm:$0xff]  }
  0x30   :  { %v2238_v7 = vld [vmem:[%s2872_s0 + $0x210] ss:$36 sps:$4 sm:$0xff]  }
  0x31   :  { %1887 = vmatpush3.bf16.msra.mxu0 %v2138_v56  ;;  %v2214_v56 = vld [vmem:[%s2872_s0 + $0x13c] ss:$36 sps:$4 sm:$0xff]  }
  0x32   :  { %1888 = vmatprep.subr.bf16.mxu0 %v2146_v62  ;;  %1951 = vmatpush3.bf16.msra.mxu1 %v2159_v9  ;;  %v2223_v62 = vld [vmem:[%s2872_s0 + $0x178] ss:$36 sps:$4 sm:$0xff]   ;;  %v2241_v9 = vld [vmem:[%s2872_s0 + $0x140] ss:$36 sps:$4 sm:$0xff]  }
  0x33   :  { %1087 = vmatmul.mubr.bf16.gmra.mxu0 %v2124_v48  ;;  %1952 = vmatprep.subr.bf16.mxu1 %v2167_v15  ;;  %v2203_v48 = vld [vmem:[%s2872_s0 + $0xa8] ss:$36 sps:$4 sm:$0xff]   ;;  %v2247_v15 = vld [vmem:[%s2872_s0 + $0x218] ss:$36 sps:$4 sm:$0xff]  }
  0x34   :  { %1184 = vmatmul.mubr.bf16.gmra.mxu1 %v2125_v51  ;;  %1094 = vmatprep.mubr.bf16.mxu0 %v2130_v52  ;;  %v2225_v51 = vld [vmem:[%s2871_s1 + $0x210] sm:$0xff]   ;;  %v2209_v52 = vld [vmem:[%s2872_s0 + $0xe8] ss:$36 sps:$4 sm:$0xff]  }
  0x35   :  { %1191 = vmatprep.mubr.bf16.mxu1 %v2132_v53  ;;  %1889 = vmatpush3.bf16.msra.mxu0 %v2148_v0  ;;  %v2232_v53 = vld [vmem:[%s2871_s1 + $0x208] sm:$0xff]  }
  0x36   :  { %1890 = vmatprep.subr.bf16.mxu0 %v2156_v6  ;;  %1953 = vmatpush3.bf16.msra.mxu1 %v2169_v17  ;;  %v2226_v0 = vld [vmem:[%s2872_s0 + $0x1c4] ss:$36 sps:$4 sm:$0xff]  }
  0x37   :  { %1954 = vmatprep.subr.bf16.mxu1 %v2170_v18  ;;  %v2237_v6 = vld [vmem:[%s2872_s0 + $0x208] ss:$36 sps:$4 sm:$0xff]  }
  0x39   :  { %1891 = vmatpush3.bf16.msra.mxu0 %v2158_v8  ;;  %v2240_v8 = vld [vmem:[%s2872_s0 + $0x20] ss:$36 sps:$4 sm:$0xff]  }
  0x3a   :  { %1892 = vmatprep.subr.bf16.mxu0 %v2166_v13  ;;  %1955 = vmatpush3.bf16.msra.mxu1 %v2171_v19  ;;  %v2245_v13 = vld [vmem:[%s2872_s0 + $0x1d0] ss:$36 sps:$4 sm:$0xff]  }
  0x3b   :  { %1095 = vmatmul.mubr.bf16.gmra.mxu0 %v2134_v58  ;;  %1956 = vmatprep.subr.bf16.mxu1 %v2179_v25  ;;  %v2216_v58 = vld [vmem:[%s2872_s0 + $0x130] ss:$36 sps:$4 sm:$0xff]  }
  0x3c   :  { %1192 = vmatmul.mubr.bf16.gmra.mxu1 %v2135_v59  ;;  %1102 = vmatprep.mubr.bf16.mxu0 %v2140_v60  ;;  %v2217_v59 = vld [vmem:[%s2872_s0 + $0x138] ss:$36 sps:$4 sm:$0xff]  }
  0x3d   :  { %1199 = vmatprep.mubr.bf16.mxu1 %v2142_v61  ;;  %1893 = vmatpush3.bf16.msra.mxu0 %v2168_v16  ;;  %v2219_v60 = vld [vmem:[%s2872_s0 + $0x17c] ss:$36 sps:$4 sm:$0xff]   ;;  %v2221_v61 = vld [vmem:[%s2872_s0 + $0x184] ss:$36 sps:$4 sm:$0xff]  }
  0x3e   :  { %1894 = vmatprep.subr.bf16.mxu0 %v2178_v24  ;;  %1957 = vmatpush3.bf16.msra.mxu1 %v2181_v27 }
  0x3f   :  { %1958 = vmatprep.subr.bf16.mxu1 %v2182_v28 }
  0x41   :  { %1895 = vmatpush3.bf16.msra.mxu0 %v2180_v26 }
  0x42   :  { %2024 = vmatprep.subr.bf16.mxu0 %v2190_v32  ;;  %1959 = vmatpush3.bf16.msra.mxu1 %v2183_v31 }
  0x43   :  { %1103 = vmatmul.mubr.bf16.gmra.mxu0 %v2144_v2  ;;  %2056 = vmatprep.subr.bf16.mxu1 %v2190_v32  ;;  %v2230_v2 = vld [vmem:[%s2872_s0 + $0x1c0] ss:$36 sps:$4 sm:$0xff]  }
  0x44   :  { %1200 = vmatmul.mubr.bf16.gmra.mxu1 %v2145_v3  ;;  %1110 = vmatprep.mubr.bf16.mxu0 %v2150_v4  ;;  %v2231_v3 = vld [vmem:[%s2872_s0 + $0x1c8] ss:$36 sps:$4 sm:$0xff]  }
  0x45   :  { %1207 = vmatprep.mubr.bf16.mxu1 %v2152_v5  ;;  %v2233_v4 = vld [vmem:[%s2872_s0 + $0x20c] ss:$36 sps:$4 sm:$0xff]   ;;  %v2235_v5 = vld [vmem:[%s2872_s0 + $0x214] ss:$36 sps:$4 sm:$0xff]  }
  0x4b   :  { %1111 = vmatmul.mubr.bf16.gmra.mxu0 %v2154_v10  ;;  %v2242_v10 = vld [vmem:[%s2872_s0 + $0x68] ss:$36 sps:$4 sm:$0xff]  }
  0x4c   :  { %1208 = vmatmul.mubr.bf16.gmra.mxu1 %v2155_v11  ;;  %1118 = vmatprep.mubr.bf16.mxu0 %v2160_v12  ;;  %v2243_v11 = vld [vmem:[%s2872_s0 + $0x188] ss:$36 sps:$4 sm:$0xff]   ;;  %v2244_v12 = vld [vmem:[%s2872_s0 + $0xb0] ss:$36 sps:$4 sm:$0xff]  }
  0x4d   :  { %1215 = vmatprep.mubr.bf16.mxu1 %v2162_v14  ;;  %v2246_v14 = vld [vmem:[%s2872_s0 + $0xf8] ss:$36 sps:$4 sm:$0xff]  }
  0x53   :  { %1119 = vmatmul.mubr.bf16.gmra.mxu0 %v2164_v20 }
  0x54   :  { %1216 = vmatmul.mubr.bf16.gmra.mxu1 %v2165_v21  ;;  %1126 = vmatprep.mubr.bf16.mxu0 %v2172_v22 }
  0x55   :  { %1223 = vmatprep.mubr.bf16.mxu1 %v2174_v23 }
  0x5b   :  { %1127 = vmatmul.mubr.bf16.gmra.mxu0 %v2176_v29 }
  0x5c   :  { %1224 = vmatmul.mubr.bf16.gmra.mxu1 %v2177_v30  ;;  %1264 = vmatprep.mubr.bf16.mxu0 %v2186_v33 }
  0x5d   :  { %1361 = vmatprep.mubr.bf16.mxu1 %v2189_v34 }
  0x63   :  { %1265 = vmatmul.mubr.bf16.vlgmr.msra.gmra.mxu0 %v2184_v35 }
  0x64   :  { %1362 = vmatmul.mubr.bf16.vlgmr.msra.gmra.mxu1 %v2187_v36  ;;  %2025 = vmatpush3.bf16.msra.mxu0 %v2190_v32 }
  0x65   :  { %1272 = vmatprep.mubr.bf16.mxu0 %v2191_v37  ;;  %1369 = vmatprep.mubr.bf16.mxu1 %v2193_v38 }
  0x66   :  { %2026 = vmatprep.subr.bf16.mxu0 %v2197_v39  ;;  %2064 = vmatpush3.bf16.msra.mxu1 %v2190_v32 }
  0x67   :  { %2057 = vmatprep.subr.bf16.mxu1 %v2197_v39 }
  0x68   :  { %2027 = vmatpush3.bf16.msra.mxu0 %v2197_v39 }
  0x69   :  { %2028 = vmatprep.subr.bf16.mxu0 %v2204_v40 }
  0x6a   :  { %2065 = vmatpush3.bf16.msra.mxu1 %v2197_v39 }
  0x6b   :  { %1273 = vmatmul.mubr.bf16.gmra.mxu0 %v2195_v41  ;;  %2058 = vmatprep.subr.bf16.mxu1 %v2204_v40 }
  0x6c   :  { %1370 = vmatmul.mubr.bf16.gmra.mxu1 %v2196_v42  ;;  %1280 = vmatprep.mubr.bf16.mxu0 %v2198_v43 }
  0x6d   :  { %1377 = vmatprep.mubr.bf16.mxu1 %v2200_v44  ;;  %2029 = vmatpush3.bf16.msra.mxu0 %v2204_v40 }
  0x6e   :  { %2030 = vmatprep.subr.bf16.mxu0 %v2211_v45  ;;  %2066 = vmatpush3.bf16.msra.mxu1 %v2204_v40 }
  0x6f   :  { %2059 = vmatprep.subr.bf16.mxu1 %v2211_v45 }
  0x71   :  { %2031 = vmatpush3.bf16.msra.mxu0 %v2211_v45 }
  0x72   :  { %2032 = vmatprep.subr.bf16.mxu0 %v2218_v46  ;;  %2067 = vmatpush3.bf16.msra.mxu1 %v2211_v45 }
  0x73   :  { %1281 = vmatmul.mubr.bf16.gmra.mxu0 %v2202_v47  ;;  %2060 = vmatprep.subr.bf16.mxu1 %v2218_v46 }
  0x74   :  { %1378 = vmatmul.mubr.bf16.gmra.mxu1 %v2203_v48  ;;  %1288 = vmatprep.mubr.bf16.mxu0 %v2205_v49 }
  0x75   :  { %1385 = vmatprep.mubr.bf16.mxu1 %v2207_v50  ;;  %2033 = vmatpush3.bf16.msra.mxu0 %v2218_v46 }
  0x76   :  { %2034 = vmatprep.subr.bf16.mxu0 %v2225_v51  ;;  %2068 = vmatpush3.bf16.msra.mxu1 %v2218_v46 }
  0x77   :  { %2061 = vmatprep.subr.bf16.mxu1 %v2225_v51 }
  0x79   :  { %2035 = vmatpush3.bf16.msra.mxu0 %v2225_v51 }
  0x7a   :  { %2036 = vmatprep.subr.bf16.mxu0 %v2232_v53  ;;  %2069 = vmatpush3.bf16.msra.mxu1 %v2225_v51 }
  0x7b   :  { %1289 = vmatmul.mubr.bf16.gmra.mxu0 %v2209_v52  ;;  %2062 = vmatprep.subr.bf16.mxu1 %v2232_v53 }
  0x7c   :  { %1386 = vmatmul.mubr.bf16.gmra.mxu1 %v2210_v54  ;;  %1296 = vmatprep.mubr.bf16.mxu0 %v2212_v55 }
  0x7d   :  { %1393 = vmatprep.mubr.bf16.mxu1 %v2214_v56  ;;  %2037 = vmatpush3.bf16.msra.mxu0 %v2232_v53 }
  0x7e   :  { %2038 = vmatprep.subr.bf16.mxu0 %v2239_v57  ;;  %2070 = vmatpush3.bf16.msra.mxu1 %v2232_v53 }
  0x7f   :  { %2063 = vmatprep.subr.bf16.mxu1 %v2239_v57 }
  0x81   :  { %2039 = vmatpush3.bf16.msra.mxu0 %v2239_v57 }
  0x82   :  { %2071 = vmatpush3.bf16.msra.mxu1 %v2239_v57 }
  0x83   :  { %1297 = vmatmul.mubr.bf16.gmra.mxu0 %v2216_v58 }
  0x84   :  { %1394 = vmatmul.mubr.bf16.gmra.mxu1 %v2217_v59  ;;  %1304 = vmatprep.mubr.bf16.mxu0 %v2219_v60 }
  0x85   :  { %1401 = vmatprep.mubr.bf16.mxu1 %v2221_v61 }
  0x8b   :  { %1305 = vmatmul.mubr.bf16.gmra.mxu0 %v2223_v62 }
  0x8c   :  { %1402 = vmatmul.mubr.bf16.gmra.mxu1 %v2224_v63  ;;  %1312 = vmatprep.mubr.bf16.mxu0 %v2226_v0 }
  0x8d   :  { %1409 = vmatprep.mubr.bf16.mxu1 %v2228_v1 }
  0x93   :  { %1313 = vmatmul.mubr.bf16.gmra.mxu0 %v2230_v2 }
  0x94   :  { %1410 = vmatmul.mubr.bf16.gmra.mxu1 %v2231_v3  ;;  %1320 = vmatprep.mubr.bf16.mxu0 %v2233_v4 }
  0x95   :  { %1417 = vmatprep.mubr.bf16.mxu1 %v2235_v5 }
  0x9b   :  { %1321 = vmatmul.mubr.bf16.gmra.mxu0 %v2237_v6 }
  0x9c   :  { %1418 = vmatmul.mubr.bf16.gmra.mxu1 %v2238_v7  ;;  %2040 = vmatprep.mubr.bf16.mxu0 %v2240_v8 }
  0x9d   :  { %2048 = vmatprep.mubr.bf16.mxu1 %v2241_v9 }
  0xa3   :  { %2041 = vmatmul.mubr.bf16.vlgmr.msra.gmra.mxu0 %v2242_v10 }
  0xa4   :  { %2049 = vmatmul.mubr.bf16.vlgmr.msra.gmra.mxu1 %v2243_v11  ;;  %2044 = vmatprep.mubr.bf16.mxu0 %v2244_v12 }
  0xa5   :  { %2052 = vmatprep.mubr.bf16.mxu1 %v2245_v13 }
  0xab   :  { %2045 = vmatmul.mubr.bf16.gmra.mxu0 %v2246_v14 }
  0xac   :  { %2053 = vmatmul.mubr.bf16.gmra.mxu1 %v2247_v15 }
  0xe3   :  { %v1768_v16 = vpop.f32.mrf.mxu0 }
  0xe4   :  { %v1832_v17 = vpop.f32.mrf.mxu1 }
  0xe5   :  { %v1769_v18 = vpop.f32.mrf.mxu0 }
  0xe6   :  { %v1770_v19 = vadd.f32 %v1769_v18, %v1768_v16  ;;  %v1833_v20 = vpop.f32.mrf.mxu1 }
  0xe7   :  { %v1834_v21 = vadd.f32 %v1833_v20, %v1832_v17  ;;  %v1771_v22 = vpop.f32.mrf.mxu0 }
  0xe8   :  { %v1835_v23 = vpop.f32.mrf.mxu1 }
  0xe9   :  { %v2700_v24 = vadd.f32 %v1834_v21, %v1770_v19  ;;  %v1772_v25 = vpop.f32.mrf.mxu0 }
  0xea   :  { %v1773_v26 = vadd.f32 %v1772_v25, %v1771_v22  ;;  %v1836_v27 = vpop.f32.mrf.mxu1 }
  0xeb   :  { %v1837_v28 = vadd.f32 %v1836_v27, %v1835_v23  ;;  %v1774_v29 = vpop.f32.mrf.mxu0 }
  0xec   :  { %v1838_v30 = vpop.f32.mrf.mxu1 }
  0xed   :  { %v2702_v31 = vadd.f32 %v1837_v28, %v1773_v26  ;;  %v1775_v32 = vpop.f32.mrf.mxu0 }
  0xee   :  { %v1776_v33 = vadd.f32 %v1775_v32, %v1774_v29  ;;  %v1839_v34 = vpop.f32.mrf.mxu1 }
  0xef   :  { %v1840_v35 = vadd.f32 %v1839_v34, %v1838_v30  ;;  %v1777_v36 = vpop.f32.mrf.mxu0 }
  0xf0   :  { %v1841_v37 = vpop.f32.mrf.mxu1 }
  0xf1   :  { %v2704_v38 = vadd.f32 %v1840_v35, %v1776_v33  ;;  %v1778_v39 = vpop.f32.mrf.mxu0 }
  0xf2   :  { %v1779_v40 = vadd.f32 %v1778_v39, %v1777_v36  ;;  %v1842_v41 = vpop.f32.mrf.mxu1 }
  0xf3   :  { %v1843_v42 = vadd.f32 %v1842_v41, %v1841_v37  ;;  %v1780_v43 = vpop.f32.mrf.mxu0 }
  0xf4   :  { %v1844_v44 = vpop.f32.mrf.mxu1 }
  0xf5   :  { %v2706_v45 = vadd.f32 %v1843_v42, %v1779_v40  ;;  %v1781_v46 = vpop.f32.mrf.mxu0 }
  0xf6   :  { %v1782_v47 = vadd.f32 %v1781_v46, %v1780_v43  ;;  %v1845_v48 = vpop.f32.mrf.mxu1 }
  0xf7   :  { %v1846_v49 = vadd.f32 %v1845_v48, %v1844_v44  ;;  %v1783_v50 = vpop.f32.mrf.mxu0 }
  0xf8   :  { %v1847_v51 = vpop.f32.mrf.mxu1 }
  0xf9   :  { %v2708_v52 = vadd.f32 %v1846_v49, %v1782_v47  ;;  %v1784_v53 = vpop.f32.mrf.mxu0 }
  0xfa   :  { %v1785_v54 = vadd.f32 %v1784_v53, %v1783_v50  ;;  %v1848_v55 = vpop.f32.mrf.mxu1 }
  0xfb   :  { %v1849_v56 = vadd.f32 %v1848_v55, %v1847_v51  ;;  %v1786_v57 = vpop.f32.mrf.mxu0 }
  0xfc   :  { %v1850_v58 = vpop.f32.mrf.mxu1 }
  0xfd   :  { %v2710_v59 = vadd.f32 %v1849_v56, %v1785_v54  ;;  %v1787_v60 = vpop.f32.mrf.mxu0 }
  0xfe   :  { %v1788_v61 = vadd.f32 %v1787_v60, %v1786_v57  ;;  %v1851_v62 = vpop.f32.mrf.mxu1 }
  0xff   :  { %2875 = vst [vmem:[#allocation2_spill] sm:$0xff] %v2710_v59  ;;  %v1852_v63 = vadd.f32 %v1851_v62, %v1850_v58  ;;  %v1789_v0 = vpop.f32.mrf.mxu0 }
 0x100   :  { %v1853_v1 = vpop.f32.mrf.mxu1 }
 0x101   :  { %v2712_v2 = vadd.f32 %v1852_v63, %v1788_v61  ;;  %v1790_v3 = vpop.f32.mrf.mxu0 }
 0x102   :  { %v1791_v4 = vadd.f32 %v1790_v3, %v1789_v0  ;;  %v1854_v5 = vpop.f32.mrf.mxu1 }
 0x103   :  { %2876 = vst [vmem:[#allocation3_spill] sm:$0xff] %v2712_v2  ;;  %v1855_v6 = vadd.f32 %v1854_v5, %v1853_v1  ;;  %v1792_v7 = vpop.f32.mrf.mxu0 }
 0x104   :  { %v1856_v8 = vpop.f32.mrf.mxu1 }
 0x105   :  { %v2714_v9 = vadd.f32 %v1855_v6, %v1791_v4  ;;  %v1793_v10 = vpop.f32.mrf.mxu0 }
 0x106   :  { %v1794_v11 = vadd.f32 %v1793_v10, %v1792_v7  ;;  %v1857_v12 = vpop.f32.mrf.mxu1 }
 0x107   :  { %2877 = vst [vmem:[#allocation4_spill] sm:$0xff] %v2714_v9  ;;  %v1858_v13 = vadd.f32 %v1857_v12, %v1856_v8  ;;  %v1795_v14 = vpop.f32.mrf.mxu0 }
 0x108   :  { %v1859_v15 = vpop.f32.mrf.mxu1 }
 0x109   :  { %v2716_v16 = vadd.f32 %v1858_v13, %v1794_v11  ;;  %v1796_v17 = vpop.f32.mrf.mxu0 }
 0x10a   :  { %v1797_v18 = vadd.f32 %v1796_v17, %v1795_v14  ;;  %v1860_v19 = vpop.f32.mrf.mxu1 }
 0x10b   :  { %v1861_v20 = vadd.f32 %v1860_v19, %v1859_v15  ;;  %v1798_v21 = vpop.f32.mrf.mxu0 }
 0x10c   :  { %v1862_v22 = vpop.f32.mrf.mxu1 }
 0x10d   :  { %v2718_v23 = vadd.f32 %v1861_v20, %v1797_v18  ;;  %v1799_v25 = vpop.f32.mrf.mxu0 }
 0x10e   :  { %v1800_v26 = vadd.f32 %v1799_v25, %v1798_v21  ;;  %v1863_v27 = vpop.f32.mrf.mxu1 }
 0x10f   :  { %2878 = vst [vmem:[#allocation5_spill] sm:$0xff] %v2718_v23  ;;  %v1864_v28 = vadd.f32 %v1863_v27, %v1862_v22  ;;  %v1801_v29 = vpop.f32.mrf.mxu0 }
 0x110   :  { %v1865_v30 = vpop.f32.mrf.mxu1 }
 0x111   :  { %v2720_v32 = vadd.f32 %v1864_v28, %v1800_v26  ;;  %v1802_v33 = vpop.f32.mrf.mxu0 }
 0x112   :  { %v1803_v34 = vadd.f32 %v1802_v33, %v1801_v29  ;;  %v1866_v35 = vpop.f32.mrf.mxu1 }
 0x113   :  { %v1867_v36 = vadd.f32 %v1866_v35, %v1865_v30  ;;  %v1804_v37 = vpop.f32.mrf.mxu0 }
 0x114   :  { %v1868_v39 = vpop.f32.mrf.mxu1 }
 0x115   :  { %v2722_v40 = vadd.f32 %v1867_v36, %v1803_v34  ;;  %v1805_v41 = vpop.f32.mrf.mxu0 }
 0x116   :  { %v1806_v42 = vadd.f32 %v1805_v41, %v1804_v37  ;;  %v1869_v43 = vpop.f32.mrf.mxu1 }
 0x117   :  { %v1870_v44 = vadd.f32 %v1869_v43, %v1868_v39  ;;  %v1807_v46 = vpop.f32.mrf.mxu0 }
 0x118   :  { %v1871_v47 = vpop.f32.mrf.mxu1 }
 0x119   :  { %v2724_v48 = vadd.f32 %v1870_v44, %v1806_v42  ;;  %v1808_v49 = vpop.f32.mrf.mxu0 }
 0x11a   :  { %v1809_v50 = vadd.f32 %v1808_v49, %v1807_v46  ;;  %v1872_v51 = vpop.f32.mrf.mxu1 }
 0x11b   :  { %2879 = vst [vmem:[#allocation6_spill] sm:$0xff] %v2724_v48  ;;  %v1873_v53 = vadd.f32 %v1872_v51, %v1871_v47  ;;  %v1810_v54 = vpop.f32.mrf.mxu0 }
 0x11c   :  { %v1874_v55 = vpop.f32.mrf.mxu1 }
 0x11d   :  { %v2726_v56 = vadd.f32 %v1873_v53, %v1809_v50  ;;  %v1811_v57 = vpop.f32.mrf.mxu0 }
 0x11e   :  { %v1812_v58 = vadd.f32 %v1811_v57, %v1810_v54  ;;  %v1875_v60 = vpop.f32.mrf.mxu1 }
 0x11f   :  { %2880 = vst [vmem:[#allocation7_spill] sm:$0xff] %v2726_v56  ;;  %v1876_v61 = vadd.f32 %v1875_v60, %v1874_v55  ;;  %v1813_v62 = vpop.f32.mrf.mxu0 }
 0x120   :  { %v1877_v63 = vpop.f32.mrf.mxu1 }
 0x121   :  { %v2728_v0 = vadd.f32 %v1876_v61, %v1812_v58  ;;  %v1814_v1 = vpop.f32.mrf.mxu0 }
 0x122   :  { %v1815_v3 = vadd.f32 %v1814_v1, %v1813_v62  ;;  %v1878_v4 = vpop.f32.mrf.mxu1 }
 0x123   :  { %2881 = vst [vmem:[#allocation8_spill] sm:$0xff] %v2728_v0  ;;  %v1879_v5 = vadd.f32 %v1878_v4, %v1877_v63  ;;  %v1896_v6 = vpop.f32.mrf.mxu0 }
 0x124   :  { %v1960_v7 = vpop.f32.mrf.mxu1 }
 0x125   :  { %v2730_v8 = vadd.f32 %v1879_v5, %v1815_v3  ;;  %v1897_v10 = vpop.f32.mrf.mxu0 }
 0x126   :  { %v1961_v11 = vpop.f32.mrf.mxu1 }
 0x127   :  { %2882 = vst [vmem:[#allocation9_spill] sm:$0xff] %v2730_v8  ;;  %v1899_v12 = vpop.f32.mrf.mxu0  ;;  %v1962_v23 = vadd.f32 %v1961_v11, %v1960_v7 }
 0x128   :  { %v1963_v13 = vpop.f32.mrf.mxu1 }
 0x129   :  { %v1900_v14 = vpop.f32.mrf.mxu0 }
 0x12a   :  { %v1964_v15 = vpop.f32.mrf.mxu1  ;;  %v1901_v0 = vadd.f32 %v1900_v14, %v1899_v12 }
 0x12b   :  { %v1902_v17 = vpop.f32.mrf.mxu0 }
 0x12c   :  { %v1966_v18 = vpop.f32.mrf.mxu1 }
 0x12d   :  { %v1903_v19 = vpop.f32.mrf.mxu0 }
 0x12e   :  { %v1967_v20 = vpop.f32.mrf.mxu1 }
 0x12f   :  { %v1905_v21 = vpop.f32.mrf.mxu0 }
 0x130   :  { %v1969_v22 = vpop.f32.mrf.mxu1 }
 0x131   :  { %v1906_v25 = vpop.f32.mrf.mxu0 }
 0x132   :  { %v1970_v26 = vpop.f32.mrf.mxu1  ;;  %v1907_v9 = vadd.f32 %v1906_v25, %v1905_v21 }
 0x133   :  { %v1908_v27 = vpop.f32.mrf.mxu0 }
 0x134   :  { %v2732_v28 = vpop.f32.mrf.mxu1  ;;  %v1278_v14 = vadd.f32 %v1907_v9, %v2706_v45 }
 0x135   :  { %v1909_v29 = vpop.f32.mrf.mxu0 }
 0x136   :  { %v2734_v30 = vpop.f32.mrf.mxu1 }
 0x137   :  { %v2736_v33 = vpop.f32.mrf.mxu0 }
 0x138   :  { %v2738_v34 = vpop.f32.mrf.mxu1 }
 0x139   :  { %2883 = vst [vmem:[#allocation10_spill] sm:$0xff] %v2738_v34  ;;  %v2740_v35 = vpop.f32.mrf.mxu0 }
 0x13a   :  { %v2742_v36 = vpop.f32.mrf.mxu1 }
 0x13b   :  { %2884 = vst [vmem:[#allocation11_spill] sm:$0xff] %v2742_v36  ;;  %v1914_v37 = vpop.f32.mrf.mxu0  ;;  %v1898_v36 = vadd.f32 %v1897_v10, %v1896_v6  ;;  %v1968_v10 = vadd.f32 %v1967_v20, %v1966_v18  ;;  %v1974_v20 = vadd.f32 %v2734_v30, %v2732_v28 }
 0x13c   :  { %v2744_v39 = vpop.f32.mrf.mxu1 }
 0x13d   :  { %2885 = vst [vmem:[#allocation12_spill] sm:$0xff] %v2744_v39  ;;  %v1915_v41 = vpop.f32.mrf.mxu0  ;;  %v1270_v39 = vadd.f32 %v1901_v0, %v2702_v31 }
 0x13e   :  { %v2746_v42 = vpop.f32.mrf.mxu1 }
 0x13f   :  { %2886 = vst [vmem:[#allocation13_spill] sm:$0xff] %v2746_v42  ;;  %v1917_v43 = vpop.f32.mrf.mxu0 }
 0x140   :  { %v2748_v44 = vpop.f32.mrf.mxu1 }
 0x141   :  { %2887 = vst [vmem:[#allocation14_spill] sm:$0xff] %v2748_v44  ;;  %v1918_v46 = vpop.f32.mrf.mxu0 }
 0x142   :  { %v2750_v47 = vpop.f32.mrf.mxu1 }
 0x143   :  { %2888 = vst [vmem:[#allocation15_spill] sm:$0xff] %v2750_v47  ;;  %v1920_v49 = vpop.f32.mrf.mxu0  ;;  %v1904_v47 = vadd.f32 %v1903_v19, %v1902_v17  ;;  %v1971_v17 = vadd.f32 %v1970_v26, %v1969_v22  ;;  %v1919_v22 = vadd.f32 %v1918_v46, %v1917_v43  ;;  %v2900_v46 = vld [vmem:[#allocation3_spill] sm:$0xff] }
 0x144   :  { %v1984_v50 = vpop.f32.mrf.mxu1 }
 0x145   :  { %v1921_v51 = vpop.f32.mrf.mxu0  ;;  %v1275_v6 = vadd.f32 %v1904_v47, %v2704_v38  ;;  %v1916_v38 = vadd.f32 %v1915_v41, %v1914_v37  ;;  %v1375_v9 = vadd.f32 %v1971_v17, %v1278_v14  ;;  %v2897_v47 = vld [vmem:[#allocation5_spill] sm:$0xff] }
 0x146   :  { %v1985_v53 = vpop.f32.mrf.mxu1  ;;  %v1922_v19 = vadd.f32 %v1921_v51, %v1920_v49  ;;  %v2896_v41 = vld [vmem:[#allocation13_spill] sm:$0xff] }
 0x147   :  { %v1923_v54 = vpop.f32.mrf.mxu0  ;;  %v1372_v31 = vadd.f32 %v1968_v10, %v1275_v6  ;;  %v1986_v18 = vadd.f32 %v1985_v53, %v1984_v50  ;;  %v1291_v51 = vadd.f32 %v1916_v38, %v2900_v46  ;;  %v2905_v6 = vld [vmem:[#allocation10_spill] sm:$0xff]  ;;  %v2906_v10 = vld [vmem:[#allocation11_spill] sm:$0xff] }
 0x148   :  { %v2752_v55 = vpop.f32.mrf.mxu1  ;;  %v1977_v14 = vadd.f32 %v2906_v10, %v2905_v6  ;;  %v2910_v38 = vld [vmem:[#allocation2_spill] sm:$0xff] }
 0x149   :  { %2889 = vst [vmem:[#allocation16_spill] sm:$0xff] %v2752_v55  ;;  %v1924_v57 = vpop.f32.mrf.mxu0  ;;  %v1267_v55 = vadd.f32 %v1898_v36, %v2700_v24 }
 0x14a   :  { %v2754_v58 = vpop.f32.mrf.mxu1  ;;  %v1925_v36 = vadd.f32 %v1924_v57, %v1923_v54  ;;  %v2903_v57 = vld [vmem:[#allocation15_spill] sm:$0xff] }
 0x14b   :  { %2890 = vst [vmem:[#allocation17_spill] sm:$0xff] %v2754_v58  ;;  %v1926_v60 = vpop.f32.mrf.mxu0  ;;  %v1364_v0 = vadd.f32 %v1962_v23, %v1267_v55  ;;  %v1913_v23 = vadd.f32 %v2740_v35, %v2736_v33  ;;  %v2902_v55 = vld [vmem:[#allocation14_spill] sm:$0xff] }
 0x14c   :  { %v1990_v61 = vpop.f32.mrf.mxu1  ;;  %v1302_v49 = vadd.f32 %v1925_v36, %v2897_v47 }
 0x14d   :  { %v1927_v62 = vpop.f32.mrf.mxu0 }
 0x14e   :  { %v1991_v63 = vpop.f32.mrf.mxu1  ;;  %v1928_v42 = vadd.f32 %v1927_v62, %v1926_v60 }
 0x14f   :  { %v1929_v1 = vpop.f32.mrf.mxu0  ;;  %v1992_v7 = vadd.f32 %v1991_v63, %v1990_v61 }
 0x150   :  { %v1993_v3 = vpop.f32.mrf.mxu1  ;;  %v1307_v24 = vadd.f32 %v1928_v42, %v2720_v32  ;;  %v2898_v50 = vld [vmem:[#allocation16_spill] sm:$0xff] }
 0x151   :  { %v1930_v4 = vpop.f32.mrf.mxu0 }
 0x152   :  { %v1994_v5 = vpop.f32.mrf.mxu1  ;;  %v1931_v25 = vadd.f32 %v1930_v4, %v1929_v1  ;;  %v2899_v28 = vld [vmem:[#allocation17_spill] sm:$0xff]  ;;  %v2904_v1 = vld [vmem:[#allocation8_spill] sm:$0xff] }
 0x153   :  { %v1932_v56 = vpop.f32.mrf.mxu0  ;;  %v1995_v32 = vadd.f32 %v1994_v5, %v1993_v3  ;;  %v1989_v30 = vadd.f32 %v2899_v28, %v2898_v50 }
 0x154   :  { %v2756_v8 = vpop.f32.mrf.mxu1  ;;  %v1310_v26 = vadd.f32 %v1931_v25, %v2722_v40 }
 0x155   :  { %2891 = vst [vmem:[#allocation18_spill] sm:$0xff] %v2756_v8  ;;  %v1933_v59 = vpop.f32.mrf.mxu0 }
 0x156   :  { %v2758_v48 = vpop.f32.mrf.mxu1  ;;  %v1934_v53 = vadd.f32 %v1933_v59, %v1932_v56  ;;  %v1407_v63 = vadd.f32 %v1995_v32, %v1310_v26 }
 0x157   :  { %2892 = vst [vmem:[#allocation19_spill] sm:$0xff] %v2758_v48  ;;  %v2760_v34 = vpop.f32.mrf.mxu0  ;;  %v1965_v48 = vadd.f32 %v1964_v15, %v1963_v13  ;;  %v1299_v15 = vadd.f32 %v1922_v19, %v2716_v16  ;;  %v2895_v16 = vld [vmem:[#allocation12_spill] sm:$0xff] }
 0x158   :  { %v2762_v44 = vpop.f32.mrf.mxu1  ;;  %v1980_v42 = vadd.f32 %v2896_v41, %v2895_v16  ;;  %v2912_v16 = vld [vmem:[#allocation7_spill] sm:$0xff] }
 0x159   :  { %2893 = vst [vmem:[#allocation20_spill] sm:$0xff] %v2762_v44  ;;  %v2764_v2 = vpop.f32.mrf.mxu0  ;;  %v1367_v13 = vadd.f32 %v1965_v48, %v1270_v39  ;;  %v1404_v39 = vadd.f32 %v1992_v7, %v1307_v24  ;;  %v1396_v33 = vadd.f32 %v1986_v18, %v1299_v15  ;;  %v1286_v15 = vadd.f32 %v1913_v23, %v2910_v38 }
 0x15a   :  { %v2766_v58 = vpop.f32.mrf.mxu1  ;;  %v1937_v36 = vadd.f32 %v2764_v2, %v2760_v34 }
 0x15b   :  { %2894 = vst [vmem:[#allocation21_spill] sm:$0xff] %v2766_v58  ;;  %v1938_v8 = vpop.f32.mrf.mxu0  ;;  %v1910_v58 = vadd.f32 %v1909_v29, %v1908_v27 }
 0x15c   :  { %v2002_v12 = vpop.f32.mrf.mxu1  ;;  %v2908_v24 = vld [vmem:[#allocation18_spill] sm:$0xff]  ;;  %v1318_v41 = vadd.f32 %v1937_v36, %v2912_v16 }
 0x15d   :  { %v1939_v21 = vpop.f32.mrf.mxu0  ;;  %v1283_v29 = vadd.f32 %v1910_v58, %v2708_v52  ;;  %v1983_v58 = vadd.f32 %v2903_v57, %v2902_v55 }
 0x15e   :  { %v2003_v44 = vpop.f32.mrf.mxu1  ;;  %v1940_v48 = vadd.f32 %v1939_v21, %v1938_v8  ;;  %v2901_v8 = vld [vmem:[#allocation4_spill] sm:$0xff]  ;;  %v1399_v21 = vadd.f32 %v1989_v30, %v1302_v49  ;;  %v2909_v7 = vld [vmem:[#allocation19_spill] sm:$0xff] }
 0x15f   :  { %v1941_v11 = vpop.f32.mrf.mxu0  ;;  %v1294_v35 = vadd.f32 %v1919_v22, %v2901_v8  ;;  %v2004_v4 = vadd.f32 %v2003_v44, %v2002_v12  ;;  %v1380_v44 = vadd.f32 %v1974_v20, %v1283_v29  ;;  %v2907_v12 = vld [vmem:[#allocation6_spill] sm:$0xff]  ;;  %v2911_v22 = vld [vmem:[#allocation9_spill] sm:$0xff]  ;;  %v1383_v8 = vadd.f32 %v1977_v14, %v1286_v15 }
 0x160   :  { %v2005_v60 = vpop.f32.mrf.mxu1  ;;  %v1323_v3 = vadd.f32 %v1940_v48, %v2904_v1  ;;  %v1315_v25 = vadd.f32 %v1934_v53, %v2907_v12 }
 0x161   :  { %v1942_v45 = vpop.f32.mrf.mxu0  ;;  %v1391_v20 = vadd.f32 %v1983_v58, %v1294_v35 }
 0x162   :  { %v2006_v27 = vpop.f32.mrf.mxu1  ;;  %v1943_v59 = vadd.f32 %v1942_v45, %v1941_v11  ;;  %v1998_v11 = vadd.f32 %v2909_v7, %v2908_v24  ;;  %v1420_v29 = vadd.f32 %v2004_v4, %v1323_v3 }
 0x163   :  { %v2042_v37 = vpop.f32.mrf.mxu0  ;;  %v2007_v34 = vadd.f32 %v2006_v27, %v2005_v60  ;;  %v2913_v60 = vld [vmem:[#allocation20_spill] sm:$0xff]  ;;  %v2914_v27 = vld [vmem:[#allocation21_spill] sm:$0xff] }
 0x164   :  { %v1469_v43 = vadd.f32 %v2042_v37, %v1372_v31  ;;  %v2050_v40 = vpop.f32.mrf.mxu1  ;;  %v1326_v2 = vadd.f32 %v1943_v59, %v2911_v22  ;;  %v1412_v50 = vadd.f32 %v1998_v11, %v1315_v25 }
 0x165   :  { %v2786_v52 = vadd.f32 %v2050_v40, %v1404_v39  ;;  %v1460_v54 = vpop.f32.mrf.mxu0 }
 0x166   :  { %1525 = vst [vmem:[%s2873_s2 + $0x10] sm:$0xff] %v1469_v43  ;;  %v1461_v61 = vadd.f32 %v1460_v54, %v1364_v0  ;;  %v1492_v62 = vpop.f32.mrf.mxu1  ;;  %v1562_v28 = vmul.f32 %v1469_v43, %v1469_v43 }
 0x167   :  { %1533 = vst [vmem:[%s2873_s2 + $0x50] sm:$0xff] %v2786_v52  ;;  %v2799_v56 = vadd.f32 %v1492_v62, %v1396_v33  ;;  %v2043_v5 = vpop.f32.mrf.mxu0  ;;  %v1423_v33 = vadd.f32 %v2007_v34, %v1326_v2 }
 0x168   :  { %1523 = vst [vmem:[%s2873_s2] sm:$0xff] %v1461_v61  ;;  %v1472_v17 = vadd.f32 %v2043_v5, %v1375_v9  ;;  %v2051_v19 = vpop.f32.mrf.mxu1  ;;  %v1388_v9 = vadd.f32 %v1980_v42, %v1291_v51  ;;  %v1560_v23 = vmul.f32 %v1461_v61, %v1461_v61  ;;  %v2001_v42 = vadd.f32 %v2914_v27, %v2913_v60 }
 0x169   :  { %1531 = vst [vmem:[%s2873_s2 + $0x40] sm:$0xff] %v2799_v56  ;;  %v2815_v31 = vadd.f32 %v2051_v19, %v1407_v63  ;;  %v1463_v0 = vpop.f32.mrf.mxu0  ;;  %v1568_v7 = vmul.f32 %v2799_v56, %v2799_v56 }
 0x16a   :  { %1526 = vst [vmem:[%s2873_s2 + $0x18] sm:$0xff] %v1472_v17  ;;  %v1464_v18 = vadd.f32 %v1463_v0, %v1367_v13  ;;  %v1495_v45 = vpop.f32.mrf.mxu1  ;;  %v1563_v35 = vmul.f32 %v1472_v17, %v1472_v17  ;;  %v1415_v63 = vadd.f32 %v2001_v42, %v1318_v41 }
 0x16b   :  { %1534 = vst [vmem:[%s2873_s2 + $0x58] sm:$0xff] %v2815_v31  ;;  %v1496_v26 = vadd.f32 %v1495_v45, %v1399_v21  ;;  %v2046_v32 = vpop.f32.mrf.mxu0 }
 0x16c   :  { %1524 = vst [vmem:[%s2873_s2 + $0x8] sm:$0xff] %v1464_v18  ;;  %v1539_v13 = vadd.f32 %v1464_v18, %v1461_v61  ;;  %v1561_v48 = vmul.f32 %v1464_v18, %v1464_v18  ;;  %v1485_v37 = vadd.f32 %v2046_v32, %v1388_v9  ;;  %v2054_v39 = vpop.f32.mrf.mxu1  ;;  %v1570_v18 = vmul.f32 %v2786_v52, %v2786_v52 }
 0x16d   :  { %1532 = vst [vmem:[%s2873_s2 + $0x48] sm:$0xff] %v1496_v26  ;;  %v1517_v47 = vadd.f32 %v2054_v39, %v1420_v29  ;;  %v1476_v49 = vpop.f32.mrf.mxu0  ;;  %v1569_v0 = vmul.f32 %v1496_v26, %v1496_v26 }
 0x16e   :  { %v1540_v30 = vadd.f32 %v1539_v13, %v1469_v43  ;;  %v1576_v40 = vadd.f32 %v1561_v48, %v1560_v23  ;;  %1529 = vst [vmem:[%s2873_s2 + $0x30] sm:$0xff] %v1485_v37  ;;  %v1477_v46 = vadd.f32 %v1476_v49, %v1380_v44  ;;  %v1508_v51 = vpop.f32.mrf.mxu1  ;;  %v1566_v19 = vmul.f32 %v1485_v37, %v1485_v37 }
 0x16f   :  { %1537 = vst [vmem:[%s2873_s2 + $0x70] sm:$0xff] %v1517_v47  ;;  %v1509_v53 = vadd.f32 %v1508_v51, %v1412_v50  ;;  %v2047_v54 = vpop.f32.mrf.mxu0  ;;  %v1574_v48 = vmul.f32 %v1517_v47, %v1517_v47 }
 0x170   :  { %v1577_v55 = vadd.f32 %v1576_v40, %v1562_v28  ;;  %1527 = vst [vmem:[%s2873_s2 + $0x20] sm:$0xff] %v1477_v46  ;;  %v1541_v43 = vadd.f32 %v1540_v30, %v1472_v17  ;;  %v1488_v57 = vadd.f32 %v2047_v54, %v1391_v20  ;;  %v2055_v58 = vpop.f32.mrf.mxu1  ;;  %v1564_v3 = vmul.f32 %v1477_v46, %v1477_v46 }
 0x171   :  { %1535 = vst [vmem:[%s2873_s2 + $0x60] sm:$0xff] %v1509_v53  ;;  %v1520_v61 = vadd.f32 %v2055_v58, %v1423_v33  ;;  %v1479_v62 = vpop.f32.mrf.mxu0  ;;  %v1571_v20 = vmul.f32 %v2815_v31, %v2815_v31  ;;  %v1572_v34 = vmul.f32 %v1509_v53, %v1509_v53 }
 0x172   :  { %v1542_v1 = vadd.f32 %v1541_v43, %v1477_v46  ;;  %v1578_v4 = vadd.f32 %v1577_v55, %v1563_v35  ;;  %1530 = vst [vmem:[%s2873_s2 + $0x38] sm:$0xff] %v1488_v57  ;;  %v1480_v59 = vadd.f32 %v1479_v62, %v1383_v8  ;;  %v1511_v5 = vpop.f32.mrf.mxu1  ;;  %v1567_v12 = vmul.f32 %v1488_v57, %v1488_v57 }
 0x173   :  { %1538 = vst [vmem:[%s2873_s2 + $0x78] sm:$0xff] %v1520_v61  ;;  %v1512_v6 = vadd.f32 %v1511_v5, %v1415_v63  ;;  %v1575_v39 = vmul.f32 %v1520_v61, %v1520_v61 }
 0x174   :  { %v1579_v10 = vadd.f32 %v1578_v4, %v1564_v3  ;;  %1528 = vst [vmem:[%s2873_s2 + $0x28] sm:$0xff] %v1480_v59  ;;  %v1543_v14 = vadd.f32 %v1542_v1, %v1480_v59  ;;  %v1565_v17 = vmul.f32 %v1480_v59, %v1480_v59 }
 0x175   :  { %1536 = vst [vmem:[%s2873_s2 + $0x68] sm:$0xff] %v1512_v6  ;;  %v1573_v23 = vmul.f32 %v1512_v6, %v1512_v6 }
 0x176   :  { %v1544_v21 = vadd.f32 %v1543_v14, %v1485_v37  ;;  %v1580_v44 = vadd.f32 %v1579_v10, %v1565_v17 }
 0x178   :  { %v1545_v25 = vadd.f32 %v1544_v21, %v1488_v57  ;;  %v1581_v24 = vadd.f32 %v1580_v44, %v1566_v19 }
 0x17a   :  { %v1546_v11 = vadd.f32 %v1545_v25, %v2799_v56  ;;  %v1582_v36 = vadd.f32 %v1581_v24, %v1567_v12 }
 0x17c   :  { %v1583_v38 = vadd.f32 %v1582_v36, %v1568_v7  ;;  %v1547_v15 = vadd.f32 %v1546_v11, %v1496_v26 }
 0x17e   :  { %v1548_v45 = vadd.f32 %v1547_v15, %v2786_v52  ;;  %v1584_v9 = vadd.f32 %v1583_v38, %v1569_v0 }
 0x180   :  { %v1549_v22 = vadd.f32 %v1548_v45, %v2815_v31  ;;  %v1585_v2 = vadd.f32 %v1584_v9, %v1570_v18 }
 0x182   :  { %v1550_v32 = vadd.f32 %v1549_v22, %v1509_v53  ;;  %v1586_v29 = vadd.f32 %v1585_v2, %v1571_v20 }
 0x184   :  { %v1551_v56 = vadd.f32 %v1550_v32, %v1512_v6  ;;  %v1587_v13 = vadd.f32 %v1586_v29, %v1572_v34 }
 0x186   :  { %v1552_v26 = vadd.f32 %v1551_v56, %v1517_v47  ;;  %v1588_v37 = vadd.f32 %v1587_v13, %v1573_v23 }
 0x188   :  { %v1553_v16 = vadd.f32 %v1552_v26, %v1520_v61  ;;  %v1589_v41 = vadd.f32 %v1588_v37, %v1574_v48 }
 0x18a   :  { %v1554_v52 = vrot.slane %v1553_v16, 4  ;;  %v1590_v60 = vadd.f32 %v1589_v41, %v1575_v39 }
 0x18c   :  { %v1555_v27 = vadd.f32 %v1554_v52, %v1553_v16  ;;  %v1591_v42 = vrot.slane %v1590_v60, 4 }
 0x18e   :  { %v1556_v49 = vrot.slane %v1555_v27, 2  ;;  %v1592_v50 = vadd.f32 %v1591_v42, %v1590_v60 }
 0x190   :  { %v1557_v31 = vadd.f32 %v1556_v49, %v1555_v27  ;;  %v1593_v28 = vrot.slane %v1592_v50, 2 }
 0x192   :  { %v1558_v30 = vrot.slane %v1557_v31, 1  ;;  %v1594_v40 = vadd.f32 %v1593_v28, %v1592_v50 }
 0x194   :  { %v1595_v46 = vrot.slane %v1594_v40, 1  ;;  %v1559_v51 = vadd.f32 %v1558_v30, %v1557_v31 }
 0x196   :  { %v1596_v53 = vadd.f32 %v1595_v46, %v1594_v40 }
 0x198   :  { %v1598_v54 = vsel %vm1597_vm0, %v1559_v51, %v1596_v53 }
 0x199   :  { %1599 = vst [vmem:[%s2874_s3] sm:$0x3] %v1598_v54 }

// kernel: basic_block_forward.9
= control target key start
LH: loop header
LB: loop body
LE: loop exit
PB: predicated region body
PF: predicated region fallthrough
CT: control target
= control target key end

     0   :  { %s413_s0 = inlined_call_operand.vmem [shape: f32[128,128], index: 0, kind: input, shape index: {}]   ;;  %s414_s1 = inlined_call_operand.vmem [shape: f32[128,128], index: 1, kind: input, shape index: {}]   ;;  %s415_s2 = inlined_call_operand.vmem [shape: f32[1,128], index: 2, kind: input, shape index: {}]   ;;  %s416_s3 = inlined_call_operand.vmem [shape: f32[1,128], index: 3, kind: input, shape index: {}]   ;;  %s417_s4 = inlined_call_operand.vmem [shape: f32[1,128], index: 4, kind: input, shape index: {}]   ;;  %s418_s5 = inlined_call_operand.vmem [shape: f32[128,128], index: 5, kind: output, shape index: {}]  }
   0x1   :  { %v20_v0 = vld [vmem:[%s413_s0] sm:$0xff]  ;;  %v21_v6 = vld [vmem:[%s413_s0 + $0x8] sm:$0xff]  ;;  %v22_v10 = vld [vmem:[%s413_s0 + $0x10] sm:$0xff] }
   0x2   :  { %v212_v1 = vld [vmem:[%s415_s2] ss:$0 sm:$0xff]  ;;  %v60_v9 = vld [vmem:[%s414_s1 + $0x8] sm:$0xff]  ;;  %v61_v11 = vld [vmem:[%s414_s1 + $0x10] sm:$0xff] }
   0x3   :  { %v59_v2 = vld [vmem:[%s414_s1] sm:$0xff]  ;;  %v43_v3 = vmul.f32 %v212_v1, %v20_v0  ;;  %v44_v8 = vmul.f32 %v212_v1, %v21_v6  ;;  %v45_v13 = vmul.f32 %v212_v1, %v22_v10  ;;  %v23_v15 = vld [vmem:[%s413_s0 + $0x18] sm:$0xff]  ;;  %v25_v23 = vld [vmem:[%s413_s0 + $0x28] sm:$0xff] }
   0x4   :  { %v221_v4 = vld [vmem:[%s416_s3] ss:$0 sm:$0xff]  ;;  %v62_v16 = vld [vmem:[%s414_s1 + $0x18] sm:$0xff]  ;;  %v46_v19 = vmul.f32 %v212_v1, %v23_v15  ;;  %v64_v24 = vld [vmem:[%s414_s1 + $0x28] sm:$0xff]  ;;  %v48_v28 = vmul.f32 %v212_v1, %v25_v23 }
   0x5   :  { %v226_v5 = vld [vmem:[%s417_s4] ss:$0 sm:$0xff]  ;;  %v82_v7 = vmul.f32 %v221_v4, %v59_v2  ;;  %v83_v12 = vmul.f32 %v221_v4, %v60_v9  ;;  %v84_v14 = vmul.f32 %v221_v4, %v61_v11  ;;  %v85_v20 = vmul.f32 %v221_v4, %v62_v16  ;;  %v26_v29 = vld [vmem:[%s413_s0 + $0x30] sm:$0xff]  ;;  %v27_v31 = vld [vmem:[%s413_s0 + $0x38] sm:$0xff] }
   0x6   :  { %v24_v17 = vld [vmem:[%s413_s0 + $0x20] sm:$0xff]  ;;  %v65_v30 = vld [vmem:[%s414_s1 + $0x30] sm:$0xff]  ;;  %v87_v34 = vmul.f32 %v221_v4, %v64_v24  ;;  %v49_v35 = vmul.f32 %v212_v1, %v26_v29  ;;  %v66_v40 = vld [vmem:[%s414_s1 + $0x38] sm:$0xff]  ;;  %v50_v45 = vmul.f32 %v212_v1, %v27_v31 }
   0x7   :  { %v98_v18 = vadd.f32 %v82_v7, %v43_v3  ;;  %v47_v21 = vmul.f32 %v212_v1, %v24_v17  ;;  %v63_v22 = vld [vmem:[%s414_s1 + $0x20] sm:$0xff]  ;;  %v99_v25 = vadd.f32 %v83_v12, %v44_v8  ;;  %v100_v26 = vadd.f32 %v84_v14, %v45_v13  ;;  %v29_v47 = vld [vmem:[%s413_s0 + $0x48] sm:$0xff]  ;;  %v30_v53 = vld [vmem:[%s413_s0 + $0x50] sm:$0xff] }
   0x8   :  { %v86_v27 = vmul.f32 %v221_v4, %v63_v22  ;;  %v101_v33 = vadd.f32 %v85_v20, %v46_v19  ;;  %v88_v39 = vmul.f32 %v221_v4, %v65_v30  ;;  %v28_v41 = vld [vmem:[%s413_s0 + $0x40] sm:$0xff]  ;;  %v103_v44 = vadd.f32 %v87_v34, %v48_v28  ;;  %v68_v52 = vld [vmem:[%s414_s1 + $0x48] sm:$0xff]  ;;  %v69_v58 = vld [vmem:[%s414_s1 + $0x50] sm:$0xff] }
   0x9   :  { %v121_v32 = vadd.f32 %v226_v5, %v98_v18  ;;  %v122_v36 = vadd.f32 %v226_v5, %v99_v25  ;;  %v123_v37 = vadd.f32 %v226_v5, %v100_v26  ;;  %v67_v46 = vld [vmem:[%s414_s1 + $0x40] sm:$0xff]  ;;  %v89_v56 = vmul.f32 %v221_v4, %v66_v40  ;;  %v31_v59 = vld [vmem:[%s413_s0 + $0x58] sm:$0xff]  ;;  %v33_v10 = vld [vmem:[%s413_s0 + $0x68] sm:$0xff] }
   0xa   :  { %v102_v38 = vadd.f32 %v86_v27, %v47_v21  ;;  %v124_v43 = vadd.f32 %v226_v5, %v101_v33  ;;  %v104_v51 = vadd.f32 %v88_v39, %v49_v35  ;;  %v126_v55 = vadd.f32 %v226_v5, %v103_v44  ;;  %v70_v0 = vld [vmem:[%s414_s1 + $0x58] sm:$0xff]  ;;  %v32_v2 = vld [vmem:[%s413_s0 + $0x60] sm:$0xff]  ;;  %v72_v15 = vld [vmem:[%s414_s1 + $0x68] sm:$0xff] }
   0xb   :  { %v137_v42 = vmax.f32 %v121_v32, 0.0  ;;  %v138_v48 = vmax.f32 %v122_v36, 0.0  ;;  %v139_v49 = vmax.f32 %v123_v37, 0.0  ;;  %v51_v57 = vmul.f32 %v212_v1, %v28_v41  ;;  %v71_v9 = vld [vmem:[%s414_s1 + $0x60] sm:$0xff]  ;;  %v34_v20 = vld [vmem:[%s413_s0 + $0x70] sm:$0xff]  ;;  %v35_v30 = vld [vmem:[%s413_s0 + $0x78] sm:$0xff] }
   0xc   :  { %v125_v50 = vadd.f32 %v226_v5, %v102_v38  ;;  %v140_v54 = vmax.f32 %v124_v43, 0.0  ;;  %v127_v61 = vadd.f32 %v226_v5, %v104_v51  ;;  %v90_v62 = vmul.f32 %v221_v4, %v67_v46  ;;  %v73_v25 = vld [vmem:[%s414_s1 + $0x70] sm:$0xff]  ;;  %v74_v31 = vld [vmem:[%s414_s1 + $0x78] sm:$0xff] }
   0xd   :  { %153 = vst [vmem:[%s418_s5] sm:$0xff] %v137_v42  ;;  %154 = vst [vmem:[%s418_s5 + $0x8] sm:$0xff] %v138_v48  ;;  %v52_v63 = vmul.f32 %v212_v1, %v29_v47  ;;  %v142_v3 = vmax.f32 %v126_v55, 0.0  ;;  %v105_v6 = vadd.f32 %v89_v56, %v50_v45  ;;  %v91_v7 = vmul.f32 %v221_v4, %v68_v52 }
   0xe   :  { %155 = vst [vmem:[%s418_s5 + $0x10] sm:$0xff] %v139_v49  ;;  %v141_v60 = vmax.f32 %v125_v50, 0.0  ;;  %156 = vst [vmem:[%s418_s5 + $0x18] sm:$0xff] %v140_v54  ;;  %v53_v8 = vmul.f32 %v212_v1, %v30_v53  ;;  %v143_v11 = vmax.f32 %v127_v61, 0.0  ;;  %v106_v12 = vadd.f32 %v90_v62, %v51_v57 }
   0xf   :  { %v92_v13 = vmul.f32 %v221_v4, %v69_v58  ;;  %v54_v14 = vmul.f32 %v212_v1, %v31_v59  ;;  %158 = vst [vmem:[%s418_s5 + $0x28] sm:$0xff] %v142_v3  ;;  %v128_v16 = vadd.f32 %v226_v5, %v105_v6  ;;  %v107_v17 = vadd.f32 %v91_v7, %v52_v63 }
  0x10   :  { %157 = vst [vmem:[%s418_s5 + $0x20] sm:$0xff] %v141_v60  ;;  %v93_v18 = vmul.f32 %v221_v4, %v70_v0  ;;  %v55_v19 = vmul.f32 %v212_v1, %v32_v2  ;;  %159 = vst [vmem:[%s418_s5 + $0x30] sm:$0xff] %v143_v11  ;;  %v129_v21 = vadd.f32 %v226_v5, %v106_v12 }
  0x11   :  { %v108_v22 = vadd.f32 %v92_v13, %v53_v8  ;;  %v94_v23 = vmul.f32 %v221_v4, %v71_v9  ;;  %v56_v24 = vmul.f32 %v212_v1, %v33_v10  ;;  %v144_v26 = vmax.f32 %v128_v16, 0.0 }
  0x12   :  { %v130_v27 = vadd.f32 %v226_v5, %v107_v17  ;;  %v109_v28 = vadd.f32 %v93_v18, %v54_v14  ;;  %v95_v29 = vmul.f32 %v221_v4, %v72_v15  ;;  %v145_v32 = vmax.f32 %v129_v21, 0.0 }
  0x13   :  { %v131_v33 = vadd.f32 %v226_v5, %v108_v22  ;;  %v110_v34 = vadd.f32 %v94_v23, %v55_v19  ;;  %v57_v35 = vmul.f32 %v212_v1, %v34_v20  ;;  %160 = vst [vmem:[%s418_s5 + $0x38] sm:$0xff] %v144_v26  ;;  %v96_v39 = vmul.f32 %v221_v4, %v73_v25 }
  0x14   :  { %v146_v36 = vmax.f32 %v130_v27, 0.0  ;;  %v132_v37 = vadd.f32 %v226_v5, %v109_v28  ;;  %v111_v38 = vadd.f32 %v95_v29, %v56_v24  ;;  %161 = vst [vmem:[%s418_s5 + $0x40] sm:$0xff] %v145_v32  ;;  %v58_v42 = vmul.f32 %v212_v1, %v35_v30 }
  0x15   :  { %v147_v40 = vmax.f32 %v131_v33, 0.0  ;;  %v133_v41 = vadd.f32 %v226_v5, %v110_v34  ;;  %v97_v43 = vmul.f32 %v221_v4, %v74_v31  ;;  %v112_v46 = vadd.f32 %v96_v39, %v57_v35 }
  0x16   :  { %162 = vst [vmem:[%s418_s5 + $0x48] sm:$0xff] %v146_v36  ;;  %v148_v44 = vmax.f32 %v132_v37, 0.0  ;;  %v134_v45 = vadd.f32 %v226_v5, %v111_v38 }
  0x17   :  { %163 = vst [vmem:[%s418_s5 + $0x50] sm:$0xff] %v147_v40  ;;  %v149_v47 = vmax.f32 %v133_v41, 0.0  ;;  %v113_v48 = vadd.f32 %v97_v43, %v58_v42  ;;  %v135_v4 = vadd.f32 %v226_v5, %v112_v46 }
  0x18   :  { %164 = vst [vmem:[%s418_s5 + $0x58] sm:$0xff] %v148_v44  ;;  %v150_v1 = vmax.f32 %v134_v45, 0.0 }
  0x19   :  { %165 = vst [vmem:[%s418_s5 + $0x60] sm:$0xff] %v149_v47  ;;  %v136_v49 = vadd.f32 %v226_v5, %v113_v48  ;;  %v151_v50 = vmax.f32 %v135_v4, 0.0 }
  0x1a   :  { %166 = vst [vmem:[%s418_s5 + $0x68] sm:$0xff] %v150_v1 }
  0x1b   :  { %v152_v51 = vmax.f32 %v136_v49, 0.0  ;;  %167 = vst [vmem:[%s418_s5 + $0x70] sm:$0xff] %v151_v50 }
  0x1d   :  { %168 = vst [vmem:[%s418_s5 + $0x78] sm:$0xff] %v152_v51 }

// kernel: basic_block_forward.8
= control target key start
LH: loop header
LB: loop body
LE: loop exit
PB: predicated region body
PF: predicated region fallthrough
CT: control target
= control target key end

     0   :  { %vm313_vm0 = vcmask 1040384   ;;  %s539_s1 = inlined_call_operand.vmem [shape: bf16[128,128], index: 1, kind: input, shape index: {}]   ;;  %s540_s0 = inlined_call_operand.vmem [shape: bf16[128,128], index: 0, kind: input, shape index: {}]   ;;  %s541_s2 = inlined_call_operand.vmem [shape: f32[128,128], index: 2, kind: output, shape index: {0}]   ;;  %s542_s3 = inlined_call_operand.vmem [shape: f32[1,2,128], index: 3, kind: output, shape index: {1}]  }
   0x1   :  { %v404_v0 = vld [vmem:[%s539_s1 + $0x38] sm:$0xff]   ;;  %v405_v1 = vld [vmem:[%s539_s1 + $0x30] sm:$0xff]   ;;  %v406_v2 = vld [vmem:[%s539_s1 + $0x28] sm:$0xff]  }
   0x2   :  { %356 = vmatprep.subr.bf16.mxu0 %v404_v0  ;;  %388 = vmatprep.subr.bf16.mxu1 %v404_v0  ;;  %v407_v3 = vld [vmem:[%s539_s1 + $0x20] sm:$0xff]   ;;  %v408_v5 = vld [vmem:[%s539_s1 + $0x18] sm:$0xff]   ;;  %v409_v7 = vld [vmem:[%s539_s1 + $0x10] sm:$0xff]  }
   0x3   :  { %357 = vmatpush3.bf16.msra.mxu0 %v404_v0  ;;  %396 = vmatpush3.bf16.msra.mxu1 %v404_v0  ;;  %v412_v4 = vld [vmem:[%s540_s0] sm:$0xff]   ;;  %v410_v8 = vld [vmem:[%s539_s1 + $0x8] sm:$0xff]   ;;  %v414_v12 = vld [vmem:[%s540_s0 + $0x10] sm:$0xff]  }
   0x4   :  { %358 = vmatprep.subr.bf16.mxu0 %v405_v1  ;;  %389 = vmatprep.subr.bf16.mxu1 %v405_v1  ;;  %v416_v6 = vld [vmem:[%s540_s0 + $0x20] sm:$0xff]   ;;  %v413_v10 = vld [vmem:[%s540_s0 + $0x8] sm:$0xff]   ;;  %v418_v13 = vld [vmem:[%s540_s0 + $0x30] sm:$0xff]  }
   0x5   :  { %372 = vmatprep.mubr.bf16.mxu0 %v412_v4  ;;  %380 = vmatprep.mubr.bf16.mxu1 %v416_v6  ;;  %v411_v9 = vld [vmem:[%s539_s1] sm:$0xff]   ;;  %v417_v11 = vld [vmem:[%s540_s0 + $0x28] sm:$0xff]   ;;  %v415_v14 = vld [vmem:[%s540_s0 + $0x18] sm:$0xff]  }
   0x6   :  { %v419_v15 = vld [vmem:[%s540_s0 + $0x38] sm:$0xff]  }
   0x7   :  { %359 = vmatpush3.bf16.msra.mxu0 %v405_v1  ;;  %397 = vmatpush3.bf16.msra.mxu1 %v405_v1 }
   0x8   :  { %360 = vmatprep.subr.bf16.mxu0 %v406_v2  ;;  %390 = vmatprep.subr.bf16.mxu1 %v406_v2 }
   0xb   :  { %361 = vmatpush3.bf16.msra.mxu0 %v406_v2  ;;  %398 = vmatpush3.bf16.msra.mxu1 %v406_v2 }
   0xc   :  { %362 = vmatprep.subr.bf16.mxu0 %v407_v3  ;;  %391 = vmatprep.subr.bf16.mxu1 %v407_v3 }
   0xf   :  { %363 = vmatpush3.bf16.msra.mxu0 %v407_v3  ;;  %399 = vmatpush3.bf16.msra.mxu1 %v407_v3 }
  0x10   :  { %364 = vmatprep.subr.bf16.mxu0 %v408_v5  ;;  %392 = vmatprep.subr.bf16.mxu1 %v408_v5 }
  0x13   :  { %365 = vmatpush3.bf16.msra.mxu0 %v408_v5  ;;  %400 = vmatpush3.bf16.msra.mxu1 %v408_v5 }
  0x14   :  { %366 = vmatprep.subr.bf16.mxu0 %v409_v7  ;;  %393 = vmatprep.subr.bf16.mxu1 %v409_v7 }
  0x17   :  { %367 = vmatpush3.bf16.msra.mxu0 %v409_v7  ;;  %401 = vmatpush3.bf16.msra.mxu1 %v409_v7 }
  0x18   :  { %368 = vmatprep.subr.bf16.mxu0 %v410_v8  ;;  %394 = vmatprep.subr.bf16.mxu1 %v410_v8 }
  0x1b   :  { %369 = vmatpush3.bf16.msra.mxu0 %v410_v8  ;;  %402 = vmatpush3.bf16.msra.mxu1 %v410_v8 }
  0x1c   :  { %370 = vmatprep.subr.bf16.mxu0 %v411_v9  ;;  %395 = vmatprep.subr.bf16.mxu1 %v411_v9 }
  0x1f   :  { %371 = vmatpush3.bf16.msra.mxu0 %v411_v9  ;;  %403 = vmatpush3.bf16.msra.mxu1 %v411_v9 }
  0x22   :  { %373 = vmatmul.mubr.bf16.vlgmr.msra.gmra.mxu0 %v413_v10  ;;  %381 = vmatmul.mubr.bf16.vlgmr.msra.gmra.mxu1 %v417_v11 }
  0x23   :  { %376 = vmatprep.mubr.bf16.mxu0 %v414_v12  ;;  %384 = vmatprep.mubr.bf16.mxu1 %v418_v13 }
  0x2a   :  { %377 = vmatmul.mubr.bf16.gmra.mxu0 %v415_v14  ;;  %385 = vmatmul.mubr.bf16.gmra.mxu1 %v419_v15 }
  0xe2   :  { %v374_v16 = vpop.f32.mrf.mxu0  ;;  %v382_v17 = vpop.f32.mrf.mxu1 }
  0xe3   :  { %241 = vst [vmem:[%s541_s2 + $0x10] sm:$0xff] %v374_v16  ;;  %249 = vst [vmem:[%s541_s2 + $0x50] sm:$0xff] %v382_v17  ;;  %v278_v29 = vmul.f32 %v374_v16, %v374_v16  ;;  %v286_v59 = vmul.f32 %v382_v17, %v382_v17 }
  0xe4   :  { %v176_v18 = vpop.f32.mrf.mxu0  ;;  %v208_v19 = vpop.f32.mrf.mxu1 }
  0xe5   :  { %239 = vst [vmem:[%s541_s2] sm:$0xff] %v176_v18  ;;  %247 = vst [vmem:[%s541_s2 + $0x40] sm:$0xff] %v208_v19  ;;  %v276_v24 = vmul.f32 %v176_v18, %v176_v18  ;;  %v284_v53 = vmul.f32 %v208_v19, %v208_v19 }
  0xe6   :  { %v375_v20 = vpop.f32.mrf.mxu0  ;;  %v383_v21 = vpop.f32.mrf.mxu1 }
  0xe7   :  { %242 = vst [vmem:[%s541_s2 + $0x18] sm:$0xff] %v375_v20  ;;  %250 = vst [vmem:[%s541_s2 + $0x58] sm:$0xff] %v383_v21  ;;  %v279_v34 = vmul.f32 %v375_v20, %v375_v20  ;;  %v287_v62 = vmul.f32 %v383_v21, %v383_v21 }
  0xe8   :  { %v179_v22 = vpop.f32.mrf.mxu0  ;;  %v211_v23 = vpop.f32.mrf.mxu1 }
  0xe9   :  { %240 = vst [vmem:[%s541_s2 + $0x8] sm:$0xff] %v179_v22  ;;  %v255_v25 = vadd.f32 %v179_v22, %v176_v18  ;;  %v277_v26 = vmul.f32 %v179_v22, %v179_v22  ;;  %248 = vst [vmem:[%s541_s2 + $0x48] sm:$0xff] %v211_v23  ;;  %v285_v57 = vmul.f32 %v211_v23, %v211_v23 }
  0xea   :  { %v378_v27 = vpop.f32.mrf.mxu0  ;;  %v386_v28 = vpop.f32.mrf.mxu1 }
  0xeb   :  { %v256_v30 = vadd.f32 %v374_v16, %v255_v25  ;;  %v292_v31 = vadd.f32 %v277_v26, %v276_v24  ;;  %245 = vst [vmem:[%s541_s2 + $0x30] sm:$0xff] %v378_v27  ;;  %253 = vst [vmem:[%s541_s2 + $0x70] sm:$0xff] %v386_v28  ;;  %v282_v47 = vmul.f32 %v378_v27, %v378_v27 }
  0xec   :  { %v192_v32 = vpop.f32.mrf.mxu0  ;;  %v224_v33 = vpop.f32.mrf.mxu1  ;;  %v290_v7 = vmul.f32 %v386_v28, %v386_v28 }
  0xed   :  { %v293_v35 = vadd.f32 %v292_v31, %v278_v29  ;;  %243 = vst [vmem:[%s541_s2 + $0x20] sm:$0xff] %v192_v32  ;;  %v257_v36 = vadd.f32 %v375_v20, %v256_v30  ;;  %251 = vst [vmem:[%s541_s2 + $0x60] sm:$0xff] %v224_v33  ;;  %v280_v40 = vmul.f32 %v192_v32, %v192_v32 }
  0xee   :  { %v379_v37 = vpop.f32.mrf.mxu0  ;;  %v387_v38 = vpop.f32.mrf.mxu1  ;;  %v288_v2 = vmul.f32 %v224_v33, %v224_v33 }
  0xef   :  { %v258_v39 = vadd.f32 %v257_v36, %v192_v32  ;;  %v294_v41 = vadd.f32 %v293_v35, %v279_v34  ;;  %246 = vst [vmem:[%s541_s2 + $0x38] sm:$0xff] %v379_v37  ;;  %254 = vst [vmem:[%s541_s2 + $0x78] sm:$0xff] %v387_v38  ;;  %v283_v50 = vmul.f32 %v379_v37, %v379_v37 }
  0xf0   :  { %v195_v42 = vpop.f32.mrf.mxu0  ;;  %v227_v43 = vpop.f32.mrf.mxu1  ;;  %v291_v10 = vmul.f32 %v387_v38, %v387_v38 }
  0xf1   :  { %v295_v44 = vadd.f32 %v294_v41, %v280_v40  ;;  %244 = vst [vmem:[%s541_s2 + $0x28] sm:$0xff] %v195_v42  ;;  %v259_v45 = vadd.f32 %v258_v39, %v195_v42  ;;  %v281_v46 = vmul.f32 %v195_v42, %v195_v42  ;;  %252 = vst [vmem:[%s541_s2 + $0x68] sm:$0xff] %v227_v43 }
  0xf2   :  { %v289_v6 = vmul.f32 %v227_v43, %v227_v43 }
  0xf3   :  { %v260_v48 = vadd.f32 %v378_v27, %v259_v45  ;;  %v296_v49 = vadd.f32 %v295_v44, %v281_v46 }
  0xf5   :  { %v261_v51 = vadd.f32 %v379_v37, %v260_v48  ;;  %v297_v52 = vadd.f32 %v296_v49, %v282_v47 }
  0xf7   :  { %v298_v54 = vadd.f32 %v297_v52, %v283_v50  ;;  %v262_v55 = vadd.f32 %v261_v51, %v208_v19 }
  0xf9   :  { %v263_v56 = vadd.f32 %v262_v55, %v211_v23  ;;  %v299_v58 = vadd.f32 %v298_v54, %v284_v53 }
  0xfb   :  { %v264_v60 = vadd.f32 %v382_v17, %v263_v56  ;;  %v300_v61 = vadd.f32 %v299_v58, %v285_v57 }
  0xfd   :  { %v301_v63 = vadd.f32 %v300_v61, %v286_v59  ;;  %v265_v0 = vadd.f32 %v383_v21, %v264_v60 }
  0xff   :  { %v266_v1 = vadd.f32 %v265_v0, %v224_v33  ;;  %v302_v3 = vadd.f32 %v301_v63, %v287_v62 }
 0x101   :  { %v303_v4 = vadd.f32 %v302_v3, %v288_v2  ;;  %v267_v5 = vadd.f32 %v266_v1, %v227_v43 }
 0x103   :  { %v268_v8 = vadd.f32 %v386_v28, %v267_v5  ;;  %v304_v9 = vadd.f32 %v303_v4, %v289_v6 }
 0x105   :  { %v269_v11 = vadd.f32 %v387_v38, %v268_v8  ;;  %v305_v12 = vadd.f32 %v304_v9, %v290_v7 }
 0x107   :  { %v270_v13 = vrot.slane %v269_v11, 4  ;;  %v306_v14 = vadd.f32 %v305_v12, %v291_v10 }
 0x109   :  { %v271_v15 = vadd.f32 %v270_v13, %v269_v11  ;;  %v307_v16 = vrot.slane %v306_v14, 4 }
 0x10b   :  { %v272_v17 = vrot.slane %v271_v15, 2  ;;  %v308_v18 = vadd.f32 %v307_v16, %v306_v14 }
 0x10d   :  { %v273_v19 = vadd.f32 %v272_v17, %v271_v15  ;;  %v309_v20 = vrot.slane %v308_v18, 2 }
 0x10f   :  { %v274_v21 = vrot.slane %v273_v19, 1  ;;  %v310_v22 = vadd.f32 %v309_v20, %v308_v18 }
 0x111   :  { %v311_v23 = vrot.slane %v310_v22, 1  ;;  %v275_v24 = vadd.f32 %v274_v21, %v273_v19 }
 0x113   :  { %v312_v25 = vadd.f32 %v311_v23, %v310_v22 }
 0x115   :  { %v314_v26 = vsel %vm313_vm0, %v275_v24, %v312_v25 }
 0x116   :  { %315 = vst [vmem:[%s542_s3] sm:$0x3] %v314_v26 }

</bundles_post_ra>
